<compile_context>
chip_gen: v7x
topology: tpu7x:2x2x1
jax: 0.10.0
libtpu: 0.0.40
codegen_flags: <defaults>
</compile_context>

<pallas_src>
import functools

import jax
import jax.numpy as jnp
from jax.experimental import pallas as pl
from jax.experimental.pallas import tpu as pltpu

LN_EPS = 1e-5


# ----------------------------------------------------------------------------
# In-kernel helpers (pure value functions; also reused by the JAX reference)
# ----------------------------------------------------------------------------
def _layernorm(x, gamma, beta):
    mean = jnp.mean(x, axis=-1, keepdims=True)
    var = jnp.mean(jnp.square(x - mean), axis=-1, keepdims=True)
    return (x - mean) * jax.lax.rsqrt(var + LN_EPS) * gamma + beta


def _mha_block(q3, k3, v3, wpack, bpack, *, num_heads, dim_k, mxu_dtype):
    """Multi-head attention on a (bt, S, D) batch tile.

    wpack: (D, 4D) = [Wq | Wk | Wv | Wo] (mxu dtype), bpack: (1, 4D) f32.
    Returns (bt*S, D) float32 (pre-residual, pre-LayerNorm).
    """
    bt, S, D = q3.shape
    N = bt * S
    inv_scale = 1.0 / (dim_k ** 0.5)

    def proj(x3, col):
        w = wpack[:, col * D:(col + 1) * D]                        # (D, D)
        b = bpack[:, col * D:(col + 1) * D]                        # (1, D)
        y = jnp.dot(x3.reshape(N, D).astype(mxu_dtype), w,
                    preferred_element_type=jnp.float32) + b        # (N, D) f32
        return y.reshape(bt, S, D).astype(mxu_dtype)

    Q = proj(q3, 0)
    K = proj(k3, 1)
    V = proj(v3, 2)
    wo = wpack[:, 3 * D:4 * D]                                     # (D, D)
    bo = bpack[:, 3 * D:4 * D]                                     # (1, D)

    acc = jnp.zeros((N, D), jnp.float32)
    for h in range(num_heads):                                     # static unroll
        lo = h * dim_k
        Qh = Q[:, :, lo:lo + dim_k]                                # (bt, S, dk)
        Kh = K[:, :, lo:lo + dim_k]
        Vh = V[:, :, lo:lo + dim_k]
        # scores contract the last (dk) dims with bt as a single batch dim — no .T
        s = jnp.einsum('bqd,bkd->bqk', Qh, Kh,
                       preferred_element_type=jnp.float32) * inv_scale
        p = jax.nn.softmax(s, axis=-1)                             # f32
        c = jnp.einsum('bqk,bkd->bqd', p.astype(mxu_dtype), Vh,
                       preferred_element_type=jnp.float32)         # (bt, S, dk)
        # fold heads with summed per-head output projections (no concatenate):
        #   concat_h(c_h) @ Wo == sum_h c_h @ Wo[h*dk:(h+1)*dk, :]
        acc = acc + jnp.dot(c.reshape(N, dim_k).astype(mxu_dtype),
                            wo[lo:lo + dim_k, :],
                            preferred_element_type=jnp.float32)
    return acc + bo                                                # (N, D) f32


def _memory_attention_block(enc3, dec3, mem4, w_enc, w_dec, b_mem, *, mxu_dtype):
    """alpha = softmax_M(mean_S(Linear([enc;dec])));  out = sum_m alpha[m]*mem[:,m]."""
    bt, S, D = enc3.shape
    M = mem4.shape[1]
    N = bt * S
    # split the concat:  [enc | dec] @ W == enc @ W[:D] + dec @ W[D:]
    scores = (jnp.dot(enc3.reshape(N, D).astype(mxu_dtype), w_enc,
                      preferred_element_type=jnp.float32)
              + jnp.dot(dec3.reshape(N, D).astype(mxu_dtype), w_dec,
                        preferred_element_type=jnp.float32)
              + b_mem)                                             # (N, M) f32
    smean = jnp.mean(scores.reshape(bt, S, M), axis=1, keepdims=True)   # (bt, 1, M)
    alpha = jax.nn.softmax(smean, axis=-1)                         # (bt, 1, M)
    # broadcast the per-batch weights back over S so every row carries them in
    # its own lanes -> (N, 1) * (N, D) broadcasts, no cross-lane scalar reads.
    alpha_rows = jnp.broadcast_to(alpha, (bt, S, M)).reshape(N, M)
    out = jnp.zeros((N, D), jnp.float32)
    for m in range(M):                                             # static, tiny VPU MACs
        out = out + alpha_rows[:, m:m + 1] * mem4[:, m].reshape(N, D)
    return out                                                     # (N, D) f32


# ----------------------------------------------------------------------------
# Fused decoder-layer kernel (one batch tile per grid step)
# ----------------------------------------------------------------------------
def _decoder_layer_kernel(tgt_ref, enc_ref, mem_ref,
                          w1p_ref, b1p_ref, g1_ref, be1_ref,        # attention_1
                          wme_ref, wmd_ref, bm_ref,                 # memory attention
                          w2p_ref, b2p_ref, g2_ref, be2_ref,        # attention_2
                          wf1_ref, bf1_ref, wf2_ref, bf2_ref,       # feed_forward
                          g3_ref, be3_ref,
                          o_ref, *, num_heads, dim_k, mxu_dtype):
    bt, S, D = tgt_ref.shape
    N = bt * S

    tgt3 = tgt_ref[...].astype(jnp.float32)                         # (bt, S, D)
    enc3 = enc_ref[...].astype(jnp.float32)

    # ---- sub-layer 1: self-attention(tgt) + residual + LayerNorm ------------
    a1 = _mha_block(tgt3, tgt3, tgt3, w1p_ref[...], b1p_ref[...],
                    num_heads=num_heads, dim_k=dim_k, mxu_dtype=mxu_dtype)
    dec = _layernorm(tgt3.reshape(N, D) + a1, g1_ref[...], be1_ref[...])
    dec3 = dec.reshape(bt, S, D)

    # ---- sub-layer 2: short-memory attention ---------------------------------
    sm = _memory_attention_block(enc3, dec3, mem_ref[...].astype(jnp.float32),
                                 wme_ref[...], wmd_ref[...], bm_ref[...],
                                 mxu_dtype=mxu_dtype)               # (N, D)

    # ---- sub-layer 3: cross-attn(q=enc, k=short_mem, v=dec) + res + LN ------
    a2 = _mha_block(enc3, sm.reshape(bt, S, D), dec3, w2p_ref[...], b2p_ref[...],
                    num_heads=num_heads, dim_k=dim_k, mxu_dtype=mxu_dtype)
    dec2 = _layernorm(enc3.reshape(N, D) + a2, g2_ref[...], be2_ref[...])

    # ---- sub-layer 4: feed-forward + residual + LayerNorm --------------------
    h = jnp.maximum(
        jnp.dot(dec2.astype(mxu_dtype), wf1_ref[...],
                preferred_element_type=jnp.float32) + bf1_ref[...], 0.0)
    y = jnp.dot(h.astype(mxu_dtype), wf2_ref[...],
                preferred_element_type=jnp.float32) + bf2_ref[...]
    out = _layernorm(dec2 + y, g3_ref[...], be3_ref[...])

    # TODO(synk): with D=32 (<128 lanes) the final store is a masked vst; a
    # lane-dense (bt, S*D) output relayout would help at large S*D but is not
    # worth the in-kernel reshape risk at these sizes.
    o_ref[...] = out.reshape(bt, S, D).astype(o_ref.dtype)


# ----------------------------------------------------------------------------
# Wrapper: weight packing + single pallas_call over batch tiles
# ----------------------------------------------------------------------------
def _pack_attention_params(p, mxu_dtype):
    wpack = jnp.concatenate([p['wq'], p['wk'], p['wv'], p['wo']], axis=1)
    bpack = jnp.concatenate([p['bq'], p['bk'], p['bv'], p['bo']], axis=1)
    return wpack.astype(mxu_dtype), bpack.astype(jnp.float32)


@functools.partial(jax.jit, static_argnames=("num_heads", "mxu_dtype", "batch_tile"))
def decoder_layer_forward(params, tgt, encoder_output, short_memory,
                          long_memory=None, src_mask=None, tgt_mask=None,
                          *, num_heads, mxu_dtype=jnp.bfloat16, batch_tile=None):
    # TODO(synk): src_mask / tgt_mask are None in the reference call (no masking);
    # long_memory is accepted but unused, exactly as in the PyTorch forward.
    del long_memory, src_mask, tgt_mask
    B, S, D = tgt.shape
    M = short_memory.shape[1]
    assert D % num_heads == 0
    dim_k = D // num_heads
    bt = B if batch_tile is None else batch_tile
    assert B % bt == 0

    w1p, b1p = _pack_attention_params(params['attn1'], mxu_dtype)
    w2p, b2p = _pack_attention_params(params['attn2'], mxu_dtype)
    w_mem = params['mem']['w']
    wme = w_mem[:D].astype(mxu_dtype)        # encoder half of the concat weight
    wmd = w_mem[D:].astype(mxu_dtype)        # decoder half
    ffn = params['ffn']

    weights = [
        w1p, b1p, params['attn1']['ln_g'], params['attn1']['ln_b'],
        wme, wmd, params['mem']['b'],
        w2p, b2p, params['attn2']['ln_g'], params['attn2']['ln_b'],
        ffn['w1'].astype(mxu_dtype), ffn['b1'],
        ffn['w2'].astype(mxu_dtype), ffn['b2'],
        ffn['ln_g'], ffn['ln_b'],
    ]

    def tile_spec(shape):
        rest = (0,) * (len(shape) - 1)
        return pl.BlockSpec((bt,) + tuple(shape[1:]), lambda i, r=rest: (i,) + r)

    def full_spec(arr):
        zeros = (0,) * arr.ndim
        return pl.BlockSpec(tuple(arr.shape), lambda i, z=zeros: z)

    kernel = functools.partial(_decoder_layer_kernel, num_heads=num_heads,
                               dim_k=dim_k, mxu_dtype=mxu_dtype)

    return pl.pallas_call(
        kernel,
        out_shape=jax.ShapeDtypeStruct((B, S, D), tgt.dtype),
        grid=(B // bt,),
        in_specs=[tile_spec(tgt.shape), tile_spec(encoder_output.shape),
                  tile_spec(short_memory.shape)] + [full_spec(w) for w in weights],
        out_specs=tile_spec((B, S, D)),
        compiler_params=pltpu.CompilerParams(
            # batch-tile axis is parallel (use batch_tile < B to shard the grid
            # across the two TensorCores on v7x).  For large S/D, raise
            # vmem_limit_bytes and tile short_memory over S instead of loading
            # the whole (bt, M, S, D) block at once (64 MiB VMEM on v7x).
            dimension_semantics=("parallel",)),
    )(tgt, encoder_output, short_memory, *weights)


# ----------------------------------------------------------------------------
# Deterministic parameter init (synthetic; Linear weights stored (in, out))
# ----------------------------------------------------------------------------
def init_params(key, dim_model, num_heads, dim_feedforward, memory_size):
    D = dim_model

    def lin(k, nin, nout):
        kw, kb = jax.random.split(k)
        bound = 1.0 / (nin ** 0.5)
        w = jax.random.uniform(kw, (nin, nout), jnp.float32, -bound, bound)
        b = jax.random.uniform(kb, (1, nout), jnp.float32, -bound, bound)
        return w, b

    def attn_params(k):
        ks = jax.random.split(k, 4)
        wq, bq = lin(ks[0], D, D)
        wk, bk = lin(ks[1], D, D)
        wv, bv = lin(ks[2], D, D)
        wo, bo = lin(ks[3], D, D)
        return dict(wq=wq, bq=bq, wk=wk, bk=bk, wv=wv, bv=bv, wo=wo, bo=bo,
                    ln_g=jnp.ones((1, D), jnp.float32),
                    ln_b=jnp.zeros((1, D), jnp.float32))

    keys = jax.random.split(key, 5)
    w_mem, b_mem = lin(keys[2], 2 * D, memory_size)
    w1, b1 = lin(keys[3], D, dim_feedforward)
    w2, b2 = lin(keys[4], dim_feedforward, D)
    return dict(
        attn1=attn_params(keys[0]),
        attn2=attn_params(keys[1]),
        mem=dict(w=w_mem, b=b_mem),
        ffn=dict(w1=w1, b1=b1, w2=w2, b2=b2,
                 ln_g=jnp.ones((1, D), jnp.float32),
                 ln_b=jnp.zeros((1, D), jnp.float32)))


# ----------------------------------------------------------------------------
# Pure-JAX reference (mirrors the PyTorch forward) for correctness checking
# ----------------------------------------------------------------------------
def _ref_mha(q, k, v, p, num_heads):
    Q = q @ p['wq'] + p['bq']
    K = k @ p['wk'] + p['bk']
    V = v @ p['wv'] + p['bv']
    D = q.shape[-1]
    dk = D // num_heads
    outs = []
    for h in range(num_heads):
        sl = slice(h * dk, (h + 1) * dk)
        s = jnp.einsum('bqd,bkd->bqk', Q[..., sl], K[..., sl]) / (dk ** 0.5)
        pr = jax.nn.softmax(s, axis=-1)
        outs.append(jnp.einsum('bqk,bkd->bqd', pr, V[..., sl]))
    attn = jnp.concatenate(outs, axis=-1) @ p['wo'] + p['bo']
    return _layernorm(q + attn, p['ln_g'], p['ln_b'])


def _ref_mem_attn(enc, dec, short_mem, p):
    combined = jnp.concatenate([enc, dec], axis=2) @ p['w'] + p['b']     # (B,S,M)
    alpha = jax.nn.softmax(jnp.mean(combined, axis=1), axis=1)           # (B,M)
    return jnp.sum(short_mem * alpha[:, :, None, None], axis=1)


def _ref_ffn(x, p):
    h = jax.nn.relu(x @ p['w1'] + p['b1'])
    return _layernorm(x + h @ p['w2'] + p['b2'], p['ln_g'], p['ln_b'])


def ref_forward(params, tgt, enc, short_mem, num_heads):
    dec = _ref_mha(tgt, tgt, tgt, params['attn1'], num_heads)
    sm = _ref_mem_attn(enc, dec, short_mem, params['mem'])
    dec = _ref_mha(enc, sm, dec, params['attn2'], num_heads)
    return _ref_ffn(dec, params['ffn'])


# ----------------------------------------------------------------------------
if __name__ == "__main__":
    B, S, D, H, F, M = 2, 8, 32, 4, 64, 5   # batch, seq, dim_model, heads, ffn, memory

    key = jax.random.PRNGKey(0)
    k_p, k_tgt, k_enc, k_mem = jax.random.split(key, 4)
    params = init_params(k_p, D, H, F, M)

    tgt = jax.random.normal(k_tgt, (B, S, D), jnp.float32)
    encoder_output = jax.random.normal(k_enc, (B, S, D), jnp.float32)
    short_memory = jax.random.normal(k_mem, (B, M, S, D), jnp.float32)
    long_memory = jnp.zeros((B, S, D), jnp.float32)   # accepted but unused

    ref = ref_forward(params, tgt, encoder_output, short_memory, H)

    # f32 MXU path — strict check against the pure-JAX reference.
    out_f32 = decoder_layer_forward(params, tgt, encoder_output, short_memory,
                                    long_memory, num_heads=H,
                                    mxu_dtype=jnp.float32)
    out_f32 = jax.block_until_ready(out_f32)
    assert out_f32.shape == (B, S, D)
    err_f32 = float(jnp.max(jnp.abs(out_f32 - ref)))
    assert err_f32 < 5e-3, f"f32 max abs error {err_f32}"

    # bf16 MXU inputs / f32 accumulation (v6e/v7x-friendly) — looser tolerance.
    out_bf16 = decoder_layer_forward(params, tgt, encoder_output, short_memory,
                                     long_memory, num_heads=H,
                                     mxu_dtype=jnp.bfloat16)
    out_bf16 = jax.block_until_ready(out_bf16)
    err_bf16 = float(jnp.max(jnp.abs(out_bf16 - ref)))
    assert err_bf16 < 5e-2, f"bf16 max abs error {err_bf16}"

    print("KERNEL_OK")
</pallas_src>

<mosaic_0001>
module attributes {stable_mosaic.version = 11 : i64} {
  func.func @_decoder_layer_kernel(%arg0: i32, %arg1: memref<2x8x32xf32, #tpu.memory_space<vmem>>, %arg2: memref<2x8x32xf32, #tpu.memory_space<vmem>>, %arg3: memref<2x5x8x32xf32, #tpu.memory_space<vmem>>, %arg4: memref<32x128xf32, #tpu.memory_space<vmem>>, %arg5: memref<1x128xf32, #tpu.memory_space<vmem>>, %arg6: memref<1x32xf32, #tpu.memory_space<vmem>>, %arg7: memref<1x32xf32, #tpu.memory_space<vmem>>, %arg8: memref<32x5xf32, #tpu.memory_space<vmem>>, %arg9: memref<32x5xf32, #tpu.memory_space<vmem>>, %arg10: memref<1x5xf32, #tpu.memory_space<vmem>>, %arg11: memref<32x128xf32, #tpu.memory_space<vmem>>, %arg12: memref<1x128xf32, #tpu.memory_space<vmem>>, %arg13: memref<1x32xf32, #tpu.memory_space<vmem>>, %arg14: memref<1x32xf32, #tpu.memory_space<vmem>>, %arg15: memref<32x64xf32, #tpu.memory_space<vmem>>, %arg16: memref<1x64xf32, #tpu.memory_space<vmem>>, %arg17: memref<64x32xf32, #tpu.memory_space<vmem>>, %arg18: memref<1x32xf32, #tpu.memory_space<vmem>>, %arg19: memref<1x32xf32, #tpu.memory_space<vmem>>, %arg20: memref<1x32xf32, #tpu.memory_space<vmem>>, %arg21: memref<2x8x32xf32, #tpu.memory_space<vmem>>) attributes {dimension_semantics = [#tpu.dimension_semantics<parallel>], iteration_bounds = array<i64: 1>, scalar_prefetch = 0 : i64, scratch_operands = 0 : i64, tpu.core_type = #tpu.core_type<tc>, window_params = [{transform_indices = @transform_0, window_bounds = array<i64: 2, 8, 32>}, {transform_indices = @transform_1, window_bounds = array<i64: 2, 8, 32>}, {transform_indices = @transform_2, window_bounds = array<i64: 2, 5, 8, 32>}, {pipeline_mode = #tpu.pipeline_mode<synchronous>, transform_indices = @transform_3, window_bounds = array<i64: 32, 128>}, {pipeline_mode = #tpu.pipeline_mode<synchronous>, transform_indices = @transform_4, window_bounds = array<i64: 1, 128>}, {pipeline_mode = #tpu.pipeline_mode<synchronous>, transform_indices = @transform_5, window_bounds = array<i64: 1, 32>}, {pipeline_mode = #tpu.pipeline_mode<synchronous>, transform_indices = @transform_6, window_bounds = array<i64: 1, 32>}, {pipeline_mode = #tpu.pipeline_mode<synchronous>, transform_indices = @transform_7, window_bounds = array<i64: 32, 5>}, {pipeline_mode = #tpu.pipeline_mode<synchronous>, transform_indices = @transform_8, window_bounds = array<i64: 32, 5>}, {pipeline_mode = #tpu.pipeline_mode<synchronous>, transform_indices = @transform_9, window_bounds = array<i64: 1, 5>}, {pipeline_mode = #tpu.pipeline_mode<synchronous>, transform_indices = @transform_10, window_bounds = array<i64: 32, 128>}, {pipeline_mode = #tpu.pipeline_mode<synchronous>, transform_indices = @transform_11, window_bounds = array<i64: 1, 128>}, {pipeline_mode = #tpu.pipeline_mode<synchronous>, transform_indices = @transform_12, window_bounds = array<i64: 1, 32>}, {pipeline_mode = #tpu.pipeline_mode<synchronous>, transform_indices = @transform_13, window_bounds = array<i64: 1, 32>}, {pipeline_mode = #tpu.pipeline_mode<synchronous>, transform_indices = @transform_14, window_bounds = array<i64: 32, 64>}, {pipeline_mode = #tpu.pipeline_mode<synchronous>, transform_indices = @transform_15, window_bounds = array<i64: 1, 64>}, {pipeline_mode = #tpu.pipeline_mode<synchronous>, transform_indices = @transform_16, window_bounds = array<i64: 64, 32>}, {pipeline_mode = #tpu.pipeline_mode<synchronous>, transform_indices = @transform_17, window_bounds = array<i64: 1, 32>}, {pipeline_mode = #tpu.pipeline_mode<synchronous>, transform_indices = @transform_18, window_bounds = array<i64: 1, 32>}, {pipeline_mode = #tpu.pipeline_mode<synchronous>, transform_indices = @transform_19, window_bounds = array<i64: 1, 32>}, {transform_indices = @transform_20, window_bounds = array<i64: 2, 8, 32>}]} {
    %c0 = arith.constant 0 : index
    %c0_0 = arith.constant 0 : index
    %c0_1 = arith.constant 0 : index
    %0 = vector.load %arg1[%c0, %c0_0, %c0_1] : memref<2x8x32xf32, #tpu.memory_space<vmem>>, vector<2x8x32xf32>
    %c0_2 = arith.constant 0 : index
    %c0_3 = arith.constant 0 : index
    %c0_4 = arith.constant 0 : index
    %1 = vector.load %arg2[%c0_2, %c0_3, %c0_4] : memref<2x8x32xf32, #tpu.memory_space<vmem>>, vector<2x8x32xf32>
    %c0_5 = arith.constant 0 : index
    %c0_6 = arith.constant 0 : index
    %2 = vector.load %arg4[%c0_5, %c0_6] : memref<32x128xf32, #tpu.memory_space<vmem>>, vector<32x128xf32>
    %c0_7 = arith.constant 0 : index
    %c0_8 = arith.constant 0 : index
    %3 = vector.load %arg5[%c0_7, %c0_8] : memref<1x128xf32, #tpu.memory_space<vmem>>, vector<1x128xf32>
    %4 = vector.extract_strided_slice %2 {offsets = [0, 0], sizes = [32, 32], strides = [1, 1]} : vector<32x128xf32> to vector<32x32xf32>
    %5 = vector.extract_strided_slice %3 {offsets = [0, 0], sizes = [1, 32], strides = [1, 1]} : vector<1x128xf32> to vector<1x32xf32>
    %6 = vector.shape_cast %0 : vector<2x8x32xf32> to vector<16x32xf32>
    %cst = arith.constant dense<0.000000e+00> : vector<16x32xf32>
    %7 = tpu.matmul %6, %4, %cst {dimension_numbers = #tpu.dot_dimension_numbers<[1], [0], [0], [1], [0, 0, 1, 1], [], []>} : vector<16x32xf32>, vector<32x32xf32>, vector<16x32xf32> -> vector<16x32xf32>
    %8 = vector.broadcast %5 : vector<1x32xf32> to vector<16x32xf32>
    %9 = arith.addf %7, %8 : vector<16x32xf32>
    %10 = vector.shape_cast %9 : vector<16x32xf32> to vector<2x8x32xf32>
    %11 = vector.extract_strided_slice %2 {offsets = [0, 32], sizes = [32, 32], strides = [1, 1]} : vector<32x128xf32> to vector<32x32xf32>
    %12 = vector.extract_strided_slice %3 {offsets = [0, 32], sizes = [1, 32], strides = [1, 1]} : vector<1x128xf32> to vector<1x32xf32>
    %13 = vector.shape_cast %0 : vector<2x8x32xf32> to vector<16x32xf32>
    %cst_9 = arith.constant dense<0.000000e+00> : vector<16x32xf32>
    %14 = tpu.matmul %13, %11, %cst_9 {dimension_numbers = #tpu.dot_dimension_numbers<[1], [0], [0], [1], [0, 0, 1, 1], [], []>} : vector<16x32xf32>, vector<32x32xf32>, vector<16x32xf32> -> vector<16x32xf32>
    %15 = vector.broadcast %12 : vector<1x32xf32> to vector<16x32xf32>
    %16 = arith.addf %14, %15 : vector<16x32xf32>
    %17 = vector.shape_cast %16 : vector<16x32xf32> to vector<2x8x32xf32>
    %18 = vector.extract_strided_slice %2 {offsets = [0, 64], sizes = [32, 32], strides = [1, 1]} : vector<32x128xf32> to vector<32x32xf32>
    %19 = vector.extract_strided_slice %3 {offsets = [0, 64], sizes = [1, 32], strides = [1, 1]} : vector<1x128xf32> to vector<1x32xf32>
    %20 = vector.shape_cast %0 : vector<2x8x32xf32> to vector<16x32xf32>
    %cst_10 = arith.constant dense<0.000000e+00> : vector<16x32xf32>
    %21 = tpu.matmul %20, %18, %cst_10 {dimension_numbers = #tpu.dot_dimension_numbers<[1], [0], [0], [1], [0, 0, 1, 1], [], []>} : vector<16x32xf32>, vector<32x32xf32>, vector<16x32xf32> -> vector<16x32xf32>
    %22 = vector.broadcast %19 : vector<1x32xf32> to vector<16x32xf32>
    %23 = arith.addf %21, %22 : vector<16x32xf32>
    %24 = vector.shape_cast %23 : vector<16x32xf32> to vector<2x8x32xf32>
    %25 = vector.extract_strided_slice %2 {offsets = [0, 96], sizes = [32, 32], strides = [1, 1]} : vector<32x128xf32> to vector<32x32xf32>
    %26 = vector.extract_strided_slice %3 {offsets = [0, 96], sizes = [1, 32], strides = [1, 1]} : vector<1x128xf32> to vector<1x32xf32>
    %cst_11 = arith.constant 0.000000e+00 : f32
    %27 = vector.broadcast %cst_11 : f32 to vector<16x32xf32>
    %28 = vector.extract_strided_slice %10 {offsets = [0, 0, 0], sizes = [2, 8, 8], strides = [1, 1, 1]} : vector<2x8x32xf32> to vector<2x8x8xf32>
    %29 = vector.extract_strided_slice %17 {offsets = [0, 0, 0], sizes = [2, 8, 8], strides = [1, 1, 1]} : vector<2x8x32xf32> to vector<2x8x8xf32>
    %30 = vector.extract_strided_slice %24 {offsets = [0, 0, 0], sizes = [2, 8, 8], strides = [1, 1, 1]} : vector<2x8x32xf32> to vector<2x8x8xf32>
    "tpu.trace_start"() <{level = 10 : i32, message = "bqd,bkd->bqk"}> : () -> ()
    %cst_12 = arith.constant dense<0.000000e+00> : vector<2x8x8xf32>
    %31 = tpu.matmul %28, %29, %cst_12 {dimension_numbers = #tpu.dot_dimension_numbers<[2], [2], [1], [1], [0, 0, 0, 1, 1, 1], [0], [0]>} : vector<2x8x8xf32>, vector<2x8x8xf32>, vector<2x8x8xf32> -> vector<2x8x8xf32>
    "tpu.trace_stop"() : () -> ()
    %cst_13 = arith.constant 0.353553385 : f32
    %32 = vector.broadcast %cst_13 : f32 to vector<2x8x8xf32>
    %33 = arith.mulf %31, %32 : vector<2x8x8xf32>
    %cst_14 = arith.constant dense<0xFF800000> : vector<2x8xf32>
    %34 = vector.multi_reduction <maximumf>, %33, %cst_14 [2] : vector<2x8x8xf32> to vector<2x8xf32>
    %cst_15 = arith.constant 0xFF800000 : f32
    %35 = vector.broadcast %cst_15 : f32 to vector<2x8xf32>
    %36 = arith.maximumf %35, %34 : vector<2x8xf32>
    %37 = vector.shape_cast %36 : vector<2x8xf32> to vector<2x8x1xf32>
    %38 = vector.broadcast %37 : vector<2x8x1xf32> to vector<2x8x8xf32>
    %39 = arith.subf %33, %38 : vector<2x8x8xf32>
    %40 = math.exp %39 : vector<2x8x8xf32>
    %cst_16 = arith.constant dense<0.000000e+00> : vector<2x8xf32>
    %41 = vector.multi_reduction <add>, %40, %cst_16 [2] : vector<2x8x8xf32> to vector<2x8xf32>
    %42 = vector.shape_cast %41 : vector<2x8xf32> to vector<2x8x1xf32>
    %43 = vector.broadcast %42 : vector<2x8x1xf32> to vector<2x8x8xf32>
    %44 = arith.divf %40, %43 : vector<2x8x8xf32>
    "tpu.trace_start"() <{level = 10 : i32, message = "bqk,bkd->bqd"}> : () -> ()
    %cst_17 = arith.constant dense<0.000000e+00> : vector<2x8x8xf32>
    %45 = tpu.matmul %44, %30, %cst_17 {dimension_numbers = #tpu.dot_dimension_numbers<[2], [1], [1], [2], [0, 0, 0, 1, 1, 2], [0], [0]>} : vector<2x8x8xf32>, vector<2x8x8xf32>, vector<2x8x8xf32> -> vector<2x8x8xf32>
    "tpu.trace_stop"() : () -> ()
    %46 = vector.shape_cast %45 : vector<2x8x8xf32> to vector<16x8xf32>
    %47 = vector.extract_strided_slice %25 {offsets = [0, 0], sizes = [8, 32], strides = [1, 1]} : vector<32x32xf32> to vector<8x32xf32>
    %cst_18 = arith.constant dense<0.000000e+00> : vector<16x32xf32>
    %48 = tpu.matmul %46, %47, %cst_18 {dimension_numbers = #tpu.dot_dimension_numbers<[1], [0], [0], [1], [0, 0, 1, 1], [], []>} : vector<16x8xf32>, vector<8x32xf32>, vector<16x32xf32> -> vector<16x32xf32>
    %49 = arith.addf %27, %48 : vector<16x32xf32>
    %50 = vector.extract_strided_slice %10 {offsets = [0, 0, 8], sizes = [2, 8, 8], strides = [1, 1, 1]} : vector<2x8x32xf32> to vector<2x8x8xf32>
    %51 = vector.extract_strided_slice %17 {offsets = [0, 0, 8], sizes = [2, 8, 8], strides = [1, 1, 1]} : vector<2x8x32xf32> to vector<2x8x8xf32>
    %52 = vector.extract_strided_slice %24 {offsets = [0, 0, 8], sizes = [2, 8, 8], strides = [1, 1, 1]} : vector<2x8x32xf32> to vector<2x8x8xf32>
    "tpu.trace_start"() <{level = 10 : i32, message = "bqd,bkd->bqk"}> : () -> ()
    %cst_19 = arith.constant dense<0.000000e+00> : vector<2x8x8xf32>
    %53 = tpu.matmul %50, %51, %cst_19 {dimension_numbers = #tpu.dot_dimension_numbers<[2], [2], [1], [1], [0, 0, 0, 1, 1, 1], [0], [0]>} : vector<2x8x8xf32>, vector<2x8x8xf32>, vector<2x8x8xf32> -> vector<2x8x8xf32>
    "tpu.trace_stop"() : () -> ()
    %cst_20 = arith.constant 0.353553385 : f32
    %54 = vector.broadcast %cst_20 : f32 to vector<2x8x8xf32>
    %55 = arith.mulf %53, %54 : vector<2x8x8xf32>
    %cst_21 = arith.constant dense<0xFF800000> : vector<2x8xf32>
    %56 = vector.multi_reduction <maximumf>, %55, %cst_21 [2] : vector<2x8x8xf32> to vector<2x8xf32>
    %cst_22 = arith.constant 0xFF800000 : f32
    %57 = vector.broadcast %cst_22 : f32 to vector<2x8xf32>
    %58 = arith.maximumf %57, %56 : vector<2x8xf32>
    %59 = vector.shape_cast %58 : vector<2x8xf32> to vector<2x8x1xf32>
    %60 = vector.broadcast %59 : vector<2x8x1xf32> to vector<2x8x8xf32>
    %61 = arith.subf %55, %60 : vector<2x8x8xf32>
    %62 = math.exp %61 : vector<2x8x8xf32>
    %cst_23 = arith.constant dense<0.000000e+00> : vector<2x8xf32>
    %63 = vector.multi_reduction <add>, %62, %cst_23 [2] : vector<2x8x8xf32> to vector<2x8xf32>
    %64 = vector.shape_cast %63 : vector<2x8xf32> to vector<2x8x1xf32>
    %65 = vector.broadcast %64 : vector<2x8x1xf32> to vector<2x8x8xf32>
    %66 = arith.divf %62, %65 : vector<2x8x8xf32>
    "tpu.trace_start"() <{level = 10 : i32, message = "bqk,bkd->bqd"}> : () -> ()
    %cst_24 = arith.constant dense<0.000000e+00> : vector<2x8x8xf32>
    %67 = tpu.matmul %66, %52, %cst_24 {dimension_numbers = #tpu.dot_dimension_numbers<[2], [1], [1], [2], [0, 0, 0, 1, 1, 2], [0], [0]>} : vector<2x8x8xf32>, vector<2x8x8xf32>, vector<2x8x8xf32> -> vector<2x8x8xf32>
    "tpu.trace_stop"() : () -> ()
    %68 = vector.shape_cast %67 : vector<2x8x8xf32> to vector<16x8xf32>
    %69 = vector.extract_strided_slice %25 {offsets = [8, 0], sizes = [8, 32], strides = [1, 1]} : vector<32x32xf32> to vector<8x32xf32>
    %cst_25 = arith.constant dense<0.000000e+00> : vector<16x32xf32>
    %70 = tpu.matmul %68, %69, %cst_25 {dimension_numbers = #tpu.dot_dimension_numbers<[1], [0], [0], [1], [0, 0, 1, 1], [], []>} : vector<16x8xf32>, vector<8x32xf32>, vector<16x32xf32> -> vector<16x32xf32>
    %71 = arith.addf %49, %70 : vector<16x32xf32>
    %72 = vector.extract_strided_slice %10 {offsets = [0, 0, 16], sizes = [2, 8, 8], strides = [1, 1, 1]} : vector<2x8x32xf32> to vector<2x8x8xf32>
    %73 = vector.extract_strided_slice %17 {offsets = [0, 0, 16], sizes = [2, 8, 8], strides = [1, 1, 1]} : vector<2x8x32xf32> to vector<2x8x8xf32>
    %74 = vector.extract_strided_slice %24 {offsets = [0, 0, 16], sizes = [2, 8, 8], strides = [1, 1, 1]} : vector<2x8x32xf32> to vector<2x8x8xf32>
    "tpu.trace_start"() <{level = 10 : i32, message = "bqd,bkd->bqk"}> : () -> ()
    %cst_26 = arith.constant dense<0.000000e+00> : vector<2x8x8xf32>
    %75 = tpu.matmul %72, %73, %cst_26 {dimension_numbers = #tpu.dot_dimension_numbers<[2], [2], [1], [1], [0, 0, 0, 1, 1, 1], [0], [0]>} : vector<2x8x8xf32>, vector<2x8x8xf32>, vector<2x8x8xf32> -> vector<2x8x8xf32>
    "tpu.trace_stop"() : () -> ()
    %cst_27 = arith.constant 0.353553385 : f32
    %76 = vector.broadcast %cst_27 : f32 to vector<2x8x8xf32>
    %77 = arith.mulf %75, %76 : vector<2x8x8xf32>
    %cst_28 = arith.constant dense<0xFF800000> : vector<2x8xf32>
    %78 = vector.multi_reduction <maximumf>, %77, %cst_28 [2] : vector<2x8x8xf32> to vector<2x8xf32>
    %cst_29 = arith.constant 0xFF800000 : f32
    %79 = vector.broadcast %cst_29 : f32 to vector<2x8xf32>
    %80 = arith.maximumf %79, %78 : vector<2x8xf32>
    %81 = vector.shape_cast %80 : vector<2x8xf32> to vector<2x8x1xf32>
    %82 = vector.broadcast %81 : vector<2x8x1xf32> to vector<2x8x8xf32>
    %83 = arith.subf %77, %82 : vector<2x8x8xf32>
    %84 = math.exp %83 : vector<2x8x8xf32>
    %cst_30 = arith.constant dense<0.000000e+00> : vector<2x8xf32>
    %85 = vector.multi_reduction <add>, %84, %cst_30 [2] : vector<2x8x8xf32> to vector<2x8xf32>
    %86 = vector.shape_cast %85 : vector<2x8xf32> to vector<2x8x1xf32>
    %87 = vector.broadcast %86 : vector<2x8x1xf32> to vector<2x8x8xf32>
    %88 = arith.divf %84, %87 : vector<2x8x8xf32>
    "tpu.trace_start"() <{level = 10 : i32, message = "bqk,bkd->bqd"}> : () -> ()
    %cst_31 = arith.constant dense<0.000000e+00> : vector<2x8x8xf32>
    %89 = tpu.matmul %88, %74, %cst_31 {dimension_numbers = #tpu.dot_dimension_numbers<[2], [1], [1], [2], [0, 0, 0, 1, 1, 2], [0], [0]>} : vector<2x8x8xf32>, vector<2x8x8xf32>, vector<2x8x8xf32> -> vector<2x8x8xf32>
    "tpu.trace_stop"() : () -> ()
    %90 = vector.shape_cast %89 : vector<2x8x8xf32> to vector<16x8xf32>
    %91 = vector.extract_strided_slice %25 {offsets = [16, 0], sizes = [8, 32], strides = [1, 1]} : vector<32x32xf32> to vector<8x32xf32>
    %cst_32 = arith.constant dense<0.000000e+00> : vector<16x32xf32>
    %92 = tpu.matmul %90, %91, %cst_32 {dimension_numbers = #tpu.dot_dimension_numbers<[1], [0], [0], [1], [0, 0, 1, 1], [], []>} : vector<16x8xf32>, vector<8x32xf32>, vector<16x32xf32> -> vector<16x32xf32>
    %93 = arith.addf %71, %92 : vector<16x32xf32>
    %94 = vector.extract_strided_slice %10 {offsets = [0, 0, 24], sizes = [2, 8, 8], strides = [1, 1, 1]} : vector<2x8x32xf32> to vector<2x8x8xf32>
    %95 = vector.extract_strided_slice %17 {offsets = [0, 0, 24], sizes = [2, 8, 8], strides = [1, 1, 1]} : vector<2x8x32xf32> to vector<2x8x8xf32>
    %96 = vector.extract_strided_slice %24 {offsets = [0, 0, 24], sizes = [2, 8, 8], strides = [1, 1, 1]} : vector<2x8x32xf32> to vector<2x8x8xf32>
    "tpu.trace_start"() <{level = 10 : i32, message = "bqd,bkd->bqk"}> : () -> ()
    %cst_33 = arith.constant dense<0.000000e+00> : vector<2x8x8xf32>
    %97 = tpu.matmul %94, %95, %cst_33 {dimension_numbers = #tpu.dot_dimension_numbers<[2], [2], [1], [1], [0, 0, 0, 1, 1, 1], [0], [0]>} : vector<2x8x8xf32>, vector<2x8x8xf32>, vector<2x8x8xf32> -> vector<2x8x8xf32>
    "tpu.trace_stop"() : () -> ()
    %cst_34 = arith.constant 0.353553385 : f32
    %98 = vector.broadcast %cst_34 : f32 to vector<2x8x8xf32>
    %99 = arith.mulf %97, %98 : vector<2x8x8xf32>
    %cst_35 = arith.constant dense<0xFF800000> : vector<2x8xf32>
    %100 = vector.multi_reduction <maximumf>, %99, %cst_35 [2] : vector<2x8x8xf32> to vector<2x8xf32>
    %cst_36 = arith.constant 0xFF800000 : f32
    %101 = vector.broadcast %cst_36 : f32 to vector<2x8xf32>
    %102 = arith.maximumf %101, %100 : vector<2x8xf32>
    %103 = vector.shape_cast %102 : vector<2x8xf32> to vector<2x8x1xf32>
    %104 = vector.broadcast %103 : vector<2x8x1xf32> to vector<2x8x8xf32>
    %105 = arith.subf %99, %104 : vector<2x8x8xf32>
    %106 = math.exp %105 : vector<2x8x8xf32>
    %cst_37 = arith.constant dense<0.000000e+00> : vector<2x8xf32>
    %107 = vector.multi_reduction <add>, %106, %cst_37 [2] : vector<2x8x8xf32> to vector<2x8xf32>
    %108 = vector.shape_cast %107 : vector<2x8xf32> to vector<2x8x1xf32>
    %109 = vector.broadcast %108 : vector<2x8x1xf32> to vector<2x8x8xf32>
    %110 = arith.divf %106, %109 : vector<2x8x8xf32>
    "tpu.trace_start"() <{level = 10 : i32, message = "bqk,bkd->bqd"}> : () -> ()
    %cst_38 = arith.constant dense<0.000000e+00> : vector<2x8x8xf32>
    %111 = tpu.matmul %110, %96, %cst_38 {dimension_numbers = #tpu.dot_dimension_numbers<[2], [1], [1], [2], [0, 0, 0, 1, 1, 2], [0], [0]>} : vector<2x8x8xf32>, vector<2x8x8xf32>, vector<2x8x8xf32> -> vector<2x8x8xf32>
    "tpu.trace_stop"() : () -> ()
    %112 = vector.shape_cast %111 : vector<2x8x8xf32> to vector<16x8xf32>
    %113 = vector.extract_strided_slice %25 {offsets = [24, 0], sizes = [8, 32], strides = [1, 1]} : vector<32x32xf32> to vector<8x32xf32>
    %cst_39 = arith.constant dense<0.000000e+00> : vector<16x32xf32>
    %114 = tpu.matmul %112, %113, %cst_39 {dimension_numbers = #tpu.dot_dimension_numbers<[1], [0], [0], [1], [0, 0, 1, 1], [], []>} : vector<16x8xf32>, vector<8x32xf32>, vector<16x32xf32> -> vector<16x32xf32>
    %115 = arith.addf %93, %114 : vector<16x32xf32>
    %116 = vector.broadcast %26 : vector<1x32xf32> to vector<16x32xf32>
    %117 = arith.addf %115, %116 : vector<16x32xf32>
    %118 = vector.shape_cast %0 : vector<2x8x32xf32> to vector<16x32xf32>
    %119 = arith.addf %118, %117 : vector<16x32xf32>
    %c0_40 = arith.constant 0 : index
    %c0_41 = arith.constant 0 : index
    %120 = vector.load %arg6[%c0_40, %c0_41] : memref<1x32xf32, #tpu.memory_space<vmem>>, vector<1x32xf32>
    %c0_42 = arith.constant 0 : index
    %c0_43 = arith.constant 0 : index
    %121 = vector.load %arg7[%c0_42, %c0_43] : memref<1x32xf32, #tpu.memory_space<vmem>>, vector<1x32xf32>
    %cst_44 = arith.constant dense<0.000000e+00> : vector<16xf32>
    %122 = vector.multi_reduction <add>, %119, %cst_44 [1] : vector<16x32xf32> to vector<16xf32>
    %123 = vector.shape_cast %122 : vector<16xf32> to vector<16x1xf32>
    %cst_45 = arith.constant 3.200000e+01 : f32
    %124 = vector.broadcast %cst_45 : f32 to vector<16x1xf32>
    %125 = arith.divf %123, %124 : vector<16x1xf32>
    %126 = vector.broadcast %125 : vector<16x1xf32> to vector<16x32xf32>
    %127 = arith.subf %119, %126 : vector<16x32xf32>
    %128 = arith.mulf %127, %127 : vector<16x32xf32>
    %cst_46 = arith.constant dense<0.000000e+00> : vector<16xf32>
    %129 = vector.multi_reduction <add>, %128, %cst_46 [1] : vector<16x32xf32> to vector<16xf32>
    %130 = vector.shape_cast %129 : vector<16xf32> to vector<16x1xf32>
    %cst_47 = arith.constant 3.200000e+01 : f32
    %131 = vector.broadcast %cst_47 : f32 to vector<16x1xf32>
    %132 = arith.divf %130, %131 : vector<16x1xf32>
    %133 = vector.broadcast %125 : vector<16x1xf32> to vector<16x32xf32>
    %134 = arith.subf %119, %133 : vector<16x32xf32>
    %cst_48 = arith.constant 9.99999974E-6 : f32
    %135 = vector.broadcast %cst_48 : f32 to vector<16x1xf32>
    %136 = arith.addf %132, %135 : vector<16x1xf32>
    %137 = math.rsqrt %136 : vector<16x1xf32>
    %138 = vector.broadcast %137 : vector<16x1xf32> to vector<16x32xf32>
    %139 = arith.mulf %134, %138 : vector<16x32xf32>
    %140 = vector.broadcast %120 : vector<1x32xf32> to vector<16x32xf32>
    %141 = arith.mulf %139, %140 : vector<16x32xf32>
    %142 = vector.broadcast %121 : vector<1x32xf32> to vector<16x32xf32>
    %143 = arith.addf %141, %142 : vector<16x32xf32>
    %144 = vector.shape_cast %143 : vector<16x32xf32> to vector<2x8x32xf32>
    %c0_49 = arith.constant 0 : index
    %c0_50 = arith.constant 0 : index
    %c0_51 = arith.constant 0 : index
    %c0_52 = arith.constant 0 : index
    %145 = vector.load %arg3[%c0_49, %c0_50, %c0_51, %c0_52] : memref<2x5x8x32xf32, #tpu.memory_space<vmem>>, vector<2x5x8x32xf32>
    %c0_53 = arith.constant 0 : index
    %c0_54 = arith.constant 0 : index
    %146 = vector.load %arg8[%c0_53, %c0_54] : memref<32x5xf32, #tpu.memory_space<vmem>>, vector<32x5xf32>
    %c0_55 = arith.constant 0 : index
    %c0_56 = arith.constant 0 : index
    %147 = vector.load %arg9[%c0_55, %c0_56] : memref<32x5xf32, #tpu.memory_space<vmem>>, vector<32x5xf32>
    %c0_57 = arith.constant 0 : index
    %c0_58 = arith.constant 0 : index
    %148 = vector.load %arg10[%c0_57, %c0_58] : memref<1x5xf32, #tpu.memory_space<vmem>>, vector<1x5xf32>
    %149 = vector.shape_cast %1 : vector<2x8x32xf32> to vector<16x32xf32>
    %cst_59 = arith.constant dense<0.000000e+00> : vector<16x5xf32>
    %150 = tpu.matmul %149, %146, %cst_59 {dimension_numbers = #tpu.dot_dimension_numbers<[1], [0], [0], [1], [0, 0, 1, 1], [], []>} : vector<16x32xf32>, vector<32x5xf32>, vector<16x5xf32> -> vector<16x5xf32>
    %151 = vector.shape_cast %144 : vector<2x8x32xf32> to vector<16x32xf32>
    %cst_60 = arith.constant dense<0.000000e+00> : vector<16x5xf32>
    %152 = tpu.matmul %151, %147, %cst_60 {dimension_numbers = #tpu.dot_dimension_numbers<[1], [0], [0], [1], [0, 0, 1, 1], [], []>} : vector<16x32xf32>, vector<32x5xf32>, vector<16x5xf32> -> vector<16x5xf32>
    %153 = arith.addf %150, %152 : vector<16x5xf32>
    %154 = vector.broadcast %148 : vector<1x5xf32> to vector<16x5xf32>
    %155 = arith.addf %153, %154 : vector<16x5xf32>
    %156 = vector.shape_cast %155 : vector<16x5xf32> to vector<2x8x5xf32>
    %cst_61 = arith.constant dense<0.000000e+00> : vector<2x5xf32>
    %157 = vector.multi_reduction <add>, %156, %cst_61 [1] : vector<2x8x5xf32> to vector<2x5xf32>
    %158 = vector.shape_cast %157 : vector<2x5xf32> to vector<2x1x5xf32>
    %cst_62 = arith.constant 8.000000e+00 : f32
    %159 = vector.broadcast %cst_62 : f32 to vector<2x1x5xf32>
    %160 = arith.divf %158, %159 : vector<2x1x5xf32>
    %cst_63 = arith.constant dense<0xFF800000> : vector<2x1xf32>
    %161 = vector.multi_reduction <maximumf>, %160, %cst_63 [2] : vector<2x1x5xf32> to vector<2x1xf32>
    %cst_64 = arith.constant 0xFF800000 : f32
    %162 = vector.broadcast %cst_64 : f32 to vector<2x1xf32>
    %163 = arith.maximumf %162, %161 : vector<2x1xf32>
    %164 = vector.shape_cast %163 : vector<2x1xf32> to vector<2x1x1xf32>
    %165 = vector.broadcast %164 : vector<2x1x1xf32> to vector<2x1x5xf32>
    %166 = arith.subf %160, %165 : vector<2x1x5xf32>
    %167 = math.exp %166 : vector<2x1x5xf32>
    %cst_65 = arith.constant dense<0.000000e+00> : vector<2x1xf32>
    %168 = vector.multi_reduction <add>, %167, %cst_65 [2] : vector<2x1x5xf32> to vector<2x1xf32>
    %169 = vector.shape_cast %168 : vector<2x1xf32> to vector<2x1x1xf32>
    %170 = vector.broadcast %169 : vector<2x1x1xf32> to vector<2x1x5xf32>
    %171 = arith.divf %167, %170 : vector<2x1x5xf32>
    %172 = vector.shape_cast %171 : vector<2x1x5xf32> to vector<2x1x5xf32>
    %173 = vector.broadcast %172 : vector<2x1x5xf32> to vector<2x8x5xf32>
    %174 = vector.shape_cast %173 : vector<2x8x5xf32> to vector<16x5xf32>
    %cst_66 = arith.constant 0.000000e+00 : f32
    %175 = vector.broadcast %cst_66 : f32 to vector<16x32xf32>
    %176 = vector.extract_strided_slice %174 {offsets = [0, 0], sizes = [16, 1], strides = [1, 1]} : vector<16x5xf32> to vector<16x1xf32>
    %177 = vector.extract_strided_slice %145 {offsets = [0, 0, 0, 0], sizes = [2, 1, 8, 32], strides = [1, 1, 1, 1]} : vector<2x5x8x32xf32> to vector<2x1x8x32xf32>
    %178 = vector.shape_cast %177 : vector<2x1x8x32xf32> to vector<2x8x32xf32>
    %179 = vector.shape_cast %178 : vector<2x8x32xf32> to vector<16x32xf32>
    %180 = vector.broadcast %176 : vector<16x1xf32> to vector<16x32xf32>
    %181 = arith.mulf %180, %179 : vector<16x32xf32>
    %182 = arith.addf %175, %181 : vector<16x32xf32>
    %183 = vector.extract_strided_slice %174 {offsets = [0, 1], sizes = [16, 1], strides = [1, 1]} : vector<16x5xf32> to vector<16x1xf32>
    %184 = vector.extract_strided_slice %145 {offsets = [0, 1, 0, 0], sizes = [2, 1, 8, 32], strides = [1, 1, 1, 1]} : vector<2x5x8x32xf32> to vector<2x1x8x32xf32>
    %185 = vector.shape_cast %184 : vector<2x1x8x32xf32> to vector<2x8x32xf32>
    %186 = vector.shape_cast %185 : vector<2x8x32xf32> to vector<16x32xf32>
    %187 = vector.broadcast %183 : vector<16x1xf32> to vector<16x32xf32>
    %188 = arith.mulf %187, %186 : vector<16x32xf32>
    %189 = arith.addf %182, %188 : vector<16x32xf32>
    %190 = vector.extract_strided_slice %174 {offsets = [0, 2], sizes = [16, 1], strides = [1, 1]} : vector<16x5xf32> to vector<16x1xf32>
    %191 = vector.extract_strided_slice %145 {offsets = [0, 2, 0, 0], sizes = [2, 1, 8, 32], strides = [1, 1, 1, 1]} : vector<2x5x8x32xf32> to vector<2x1x8x32xf32>
    %192 = vector.shape_cast %191 : vector<2x1x8x32xf32> to vector<2x8x32xf32>
    %193 = vector.shape_cast %192 : vector<2x8x32xf32> to vector<16x32xf32>
    %194 = vector.broadcast %190 : vector<16x1xf32> to vector<16x32xf32>
    %195 = arith.mulf %194, %193 : vector<16x32xf32>
    %196 = arith.addf %189, %195 : vector<16x32xf32>
    %197 = vector.extract_strided_slice %174 {offsets = [0, 3], sizes = [16, 1], strides = [1, 1]} : vector<16x5xf32> to vector<16x1xf32>
    %198 = vector.extract_strided_slice %145 {offsets = [0, 3, 0, 0], sizes = [2, 1, 8, 32], strides = [1, 1, 1, 1]} : vector<2x5x8x32xf32> to vector<2x1x8x32xf32>
    %199 = vector.shape_cast %198 : vector<2x1x8x32xf32> to vector<2x8x32xf32>
    %200 = vector.shape_cast %199 : vector<2x8x32xf32> to vector<16x32xf32>
    %201 = vector.broadcast %197 : vector<16x1xf32> to vector<16x32xf32>
    %202 = arith.mulf %201, %200 : vector<16x32xf32>
    %203 = arith.addf %196, %202 : vector<16x32xf32>
    %204 = vector.extract_strided_slice %174 {offsets = [0, 4], sizes = [16, 1], strides = [1, 1]} : vector<16x5xf32> to vector<16x1xf32>
    %205 = vector.extract_strided_slice %145 {offsets = [0, 4, 0, 0], sizes = [2, 1, 8, 32], strides = [1, 1, 1, 1]} : vector<2x5x8x32xf32> to vector<2x1x8x32xf32>
    %206 = vector.shape_cast %205 : vector<2x1x8x32xf32> to vector<2x8x32xf32>
    %207 = vector.shape_cast %206 : vector<2x8x32xf32> to vector<16x32xf32>
    %208 = vector.broadcast %204 : vector<16x1xf32> to vector<16x32xf32>
    %209 = arith.mulf %208, %207 : vector<16x32xf32>
    %210 = arith.addf %203, %209 : vector<16x32xf32>
    %211 = vector.shape_cast %210 : vector<16x32xf32> to vector<2x8x32xf32>
    %c0_67 = arith.constant 0 : index
    %c0_68 = arith.constant 0 : index
    %212 = vector.load %arg11[%c0_67, %c0_68] : memref<32x128xf32, #tpu.memory_space<vmem>>, vector<32x128xf32>
    %c0_69 = arith.constant 0 : index
    %c0_70 = arith.constant 0 : index
    %213 = vector.load %arg12[%c0_69, %c0_70] : memref<1x128xf32, #tpu.memory_space<vmem>>, vector<1x128xf32>
    %214 = vector.extract_strided_slice %212 {offsets = [0, 0], sizes = [32, 32], strides = [1, 1]} : vector<32x128xf32> to vector<32x32xf32>
    %215 = vector.extract_strided_slice %213 {offsets = [0, 0], sizes = [1, 32], strides = [1, 1]} : vector<1x128xf32> to vector<1x32xf32>
    %216 = vector.shape_cast %1 : vector<2x8x32xf32> to vector<16x32xf32>
    %cst_71 = arith.constant dense<0.000000e+00> : vector<16x32xf32>
    %217 = tpu.matmul %216, %214, %cst_71 {dimension_numbers = #tpu.dot_dimension_numbers<[1], [0], [0], [1], [0, 0, 1, 1], [], []>} : vector<16x32xf32>, vector<32x32xf32>, vector<16x32xf32> -> vector<16x32xf32>
    %218 = vector.broadcast %215 : vector<1x32xf32> to vector<16x32xf32>
    %219 = arith.addf %217, %218 : vector<16x32xf32>
    %220 = vector.shape_cast %219 : vector<16x32xf32> to vector<2x8x32xf32>
    %221 = vector.extract_strided_slice %212 {offsets = [0, 32], sizes = [32, 32], strides = [1, 1]} : vector<32x128xf32> to vector<32x32xf32>
    %222 = vector.extract_strided_slice %213 {offsets = [0, 32], sizes = [1, 32], strides = [1, 1]} : vector<1x128xf32> to vector<1x32xf32>
    %223 = vector.shape_cast %211 : vector<2x8x32xf32> to vector<16x32xf32>
    %cst_72 = arith.constant dense<0.000000e+00> : vector<16x32xf32>
    %224 = tpu.matmul %223, %221, %cst_72 {dimension_numbers = #tpu.dot_dimension_numbers<[1], [0], [0], [1], [0, 0, 1, 1], [], []>} : vector<16x32xf32>, vector<32x32xf32>, vector<16x32xf32> -> vector<16x32xf32>
    %225 = vector.broadcast %222 : vector<1x32xf32> to vector<16x32xf32>
    %226 = arith.addf %224, %225 : vector<16x32xf32>
    %227 = vector.shape_cast %226 : vector<16x32xf32> to vector<2x8x32xf32>
    %228 = vector.extract_strided_slice %212 {offsets = [0, 64], sizes = [32, 32], strides = [1, 1]} : vector<32x128xf32> to vector<32x32xf32>
    %229 = vector.extract_strided_slice %213 {offsets = [0, 64], sizes = [1, 32], strides = [1, 1]} : vector<1x128xf32> to vector<1x32xf32>
    %230 = vector.shape_cast %144 : vector<2x8x32xf32> to vector<16x32xf32>
    %cst_73 = arith.constant dense<0.000000e+00> : vector<16x32xf32>
    %231 = tpu.matmul %230, %228, %cst_73 {dimension_numbers = #tpu.dot_dimension_numbers<[1], [0], [0], [1], [0, 0, 1, 1], [], []>} : vector<16x32xf32>, vector<32x32xf32>, vector<16x32xf32> -> vector<16x32xf32>
    %232 = vector.broadcast %229 : vector<1x32xf32> to vector<16x32xf32>
    %233 = arith.addf %231, %232 : vector<16x32xf32>
    %234 = vector.shape_cast %233 : vector<16x32xf32> to vector<2x8x32xf32>
    %235 = vector.extract_strided_slice %212 {offsets = [0, 96], sizes = [32, 32], strides = [1, 1]} : vector<32x128xf32> to vector<32x32xf32>
    %236 = vector.extract_strided_slice %213 {offsets = [0, 96], sizes = [1, 32], strides = [1, 1]} : vector<1x128xf32> to vector<1x32xf32>
    %cst_74 = arith.constant 0.000000e+00 : f32
    %237 = vector.broadcast %cst_74 : f32 to vector<16x32xf32>
    %238 = vector.extract_strided_slice %220 {offsets = [0, 0, 0], sizes = [2, 8, 8], strides = [1, 1, 1]} : vector<2x8x32xf32> to vector<2x8x8xf32>
    %239 = vector.extract_strided_slice %227 {offsets = [0, 0, 0], sizes = [2, 8, 8], strides = [1, 1, 1]} : vector<2x8x32xf32> to vector<2x8x8xf32>
    %240 = vector.extract_strided_slice %234 {offsets = [0, 0, 0], sizes = [2, 8, 8], strides = [1, 1, 1]} : vector<2x8x32xf32> to vector<2x8x8xf32>
    "tpu.trace_start"() <{level = 10 : i32, message = "bqd,bkd->bqk"}> : () -> ()
    %cst_75 = arith.constant dense<0.000000e+00> : vector<2x8x8xf32>
    %241 = tpu.matmul %238, %239, %cst_75 {dimension_numbers = #tpu.dot_dimension_numbers<[2], [2], [1], [1], [0, 0, 0, 1, 1, 1], [0], [0]>} : vector<2x8x8xf32>, vector<2x8x8xf32>, vector<2x8x8xf32> -> vector<2x8x8xf32>
    "tpu.trace_stop"() : () -> ()
    %cst_76 = arith.constant 0.353553385 : f32
    %242 = vector.broadcast %cst_76 : f32 to vector<2x8x8xf32>
    %243 = arith.mulf %241, %242 : vector<2x8x8xf32>
    %cst_77 = arith.constant dense<0xFF800000> : vector<2x8xf32>
    %244 = vector.multi_reduction <maximumf>, %243, %cst_77 [2] : vector<2x8x8xf32> to vector<2x8xf32>
    %cst_78 = arith.constant 0xFF800000 : f32
    %245 = vector.broadcast %cst_78 : f32 to vector<2x8xf32>
    %246 = arith.maximumf %245, %244 : vector<2x8xf32>
    %247 = vector.shape_cast %246 : vector<2x8xf32> to vector<2x8x1xf32>
    %248 = vector.broadcast %247 : vector<2x8x1xf32> to vector<2x8x8xf32>
    %249 = arith.subf %243, %248 : vector<2x8x8xf32>
    %250 = math.exp %249 : vector<2x8x8xf32>
    %cst_79 = arith.constant dense<0.000000e+00> : vector<2x8xf32>
    %251 = vector.multi_reduction <add>, %250, %cst_79 [2] : vector<2x8x8xf32> to vector<2x8xf32>
    %252 = vector.shape_cast %251 : vector<2x8xf32> to vector<2x8x1xf32>
    %253 = vector.broadcast %252 : vector<2x8x1xf32> to vector<2x8x8xf32>
    %254 = arith.divf %250, %253 : vector<2x8x8xf32>
    "tpu.trace_start"() <{level = 10 : i32, message = "bqk,bkd->bqd"}> : () -> ()
    %cst_80 = arith.constant dense<0.000000e+00> : vector<2x8x8xf32>
    %255 = tpu.matmul %254, %240, %cst_80 {dimension_numbers = #tpu.dot_dimension_numbers<[2], [1], [1], [2], [0, 0, 0, 1, 1, 2], [0], [0]>} : vector<2x8x8xf32>, vector<2x8x8xf32>, vector<2x8x8xf32> -> vector<2x8x8xf32>
    "tpu.trace_stop"() : () -> ()
    %256 = vector.shape_cast %255 : vector<2x8x8xf32> to vector<16x8xf32>
    %257 = vector.extract_strided_slice %235 {offsets = [0, 0], sizes = [8, 32], strides = [1, 1]} : vector<32x32xf32> to vector<8x32xf32>
    %cst_81 = arith.constant dense<0.000000e+00> : vector<16x32xf32>
    %258 = tpu.matmul %256, %257, %cst_81 {dimension_numbers = #tpu.dot_dimension_numbers<[1], [0], [0], [1], [0, 0, 1, 1], [], []>} : vector<16x8xf32>, vector<8x32xf32>, vector<16x32xf32> -> vector<16x32xf32>
    %259 = arith.addf %237, %258 : vector<16x32xf32>
    %260 = vector.extract_strided_slice %220 {offsets = [0, 0, 8], sizes = [2, 8, 8], strides = [1, 1, 1]} : vector<2x8x32xf32> to vector<2x8x8xf32>
    %261 = vector.extract_strided_slice %227 {offsets = [0, 0, 8], sizes = [2, 8, 8], strides = [1, 1, 1]} : vector<2x8x32xf32> to vector<2x8x8xf32>
    %262 = vector.extract_strided_slice %234 {offsets = [0, 0, 8], sizes = [2, 8, 8], strides = [1, 1, 1]} : vector<2x8x32xf32> to vector<2x8x8xf32>
    "tpu.trace_start"() <{level = 10 : i32, message = "bqd,bkd->bqk"}> : () -> ()
    %cst_82 = arith.constant dense<0.000000e+00> : vector<2x8x8xf32>
    %263 = tpu.matmul %260, %261, %cst_82 {dimension_numbers = #tpu.dot_dimension_numbers<[2], [2], [1], [1], [0, 0, 0, 1, 1, 1], [0], [0]>} : vector<2x8x8xf32>, vector<2x8x8xf32>, vector<2x8x8xf32> -> vector<2x8x8xf32>
    "tpu.trace_stop"() : () -> ()
    %cst_83 = arith.constant 0.353553385 : f32
    %264 = vector.broadcast %cst_83 : f32 to vector<2x8x8xf32>
    %265 = arith.mulf %263, %264 : vector<2x8x8xf32>
    %cst_84 = arith.constant dense<0xFF800000> : vector<2x8xf32>
    %266 = vector.multi_reduction <maximumf>, %265, %cst_84 [2] : vector<2x8x8xf32> to vector<2x8xf32>
    %cst_85 = arith.constant 0xFF800000 : f32
    %267 = vector.broadcast %cst_85 : f32 to vector<2x8xf32>
    %268 = arith.maximumf %267, %266 : vector<2x8xf32>
    %269 = vector.shape_cast %268 : vector<2x8xf32> to vector<2x8x1xf32>
    %270 = vector.broadcast %269 : vector<2x8x1xf32> to vector<2x8x8xf32>
    %271 = arith.subf %265, %270 : vector<2x8x8xf32>
    %272 = math.exp %271 : vector<2x8x8xf32>
    %cst_86 = arith.constant dense<0.000000e+00> : vector<2x8xf32>
    %273 = vector.multi_reduction <add>, %272, %cst_86 [2] : vector<2x8x8xf32> to vector<2x8xf32>
    %274 = vector.shape_cast %273 : vector<2x8xf32> to vector<2x8x1xf32>
    %275 = vector.broadcast %274 : vector<2x8x1xf32> to vector<2x8x8xf32>
    %276 = arith.divf %272, %275 : vector<2x8x8xf32>
    "tpu.trace_start"() <{level = 10 : i32, message = "bqk,bkd->bqd"}> : () -> ()
    %cst_87 = arith.constant dense<0.000000e+00> : vector<2x8x8xf32>
    %277 = tpu.matmul %276, %262, %cst_87 {dimension_numbers = #tpu.dot_dimension_numbers<[2], [1], [1], [2], [0, 0, 0, 1, 1, 2], [0], [0]>} : vector<2x8x8xf32>, vector<2x8x8xf32>, vector<2x8x8xf32> -> vector<2x8x8xf32>
    "tpu.trace_stop"() : () -> ()
    %278 = vector.shape_cast %277 : vector<2x8x8xf32> to vector<16x8xf32>
    %279 = vector.extract_strided_slice %235 {offsets = [8, 0], sizes = [8, 32], strides = [1, 1]} : vector<32x32xf32> to vector<8x32xf32>
    %cst_88 = arith.constant dense<0.000000e+00> : vector<16x32xf32>
    %280 = tpu.matmul %278, %279, %cst_88 {dimension_numbers = #tpu.dot_dimension_numbers<[1], [0], [0], [1], [0, 0, 1, 1], [], []>} : vector<16x8xf32>, vector<8x32xf32>, vector<16x32xf32> -> vector<16x32xf32>
    %281 = arith.addf %259, %280 : vector<16x32xf32>
    %282 = vector.extract_strided_slice %220 {offsets = [0, 0, 16], sizes = [2, 8, 8], strides = [1, 1, 1]} : vector<2x8x32xf32> to vector<2x8x8xf32>
    %283 = vector.extract_strided_slice %227 {offsets = [0, 0, 16], sizes = [2, 8, 8], strides = [1, 1, 1]} : vector<2x8x32xf32> to vector<2x8x8xf32>
    %284 = vector.extract_strided_slice %234 {offsets = [0, 0, 16], sizes = [2, 8, 8], strides = [1, 1, 1]} : vector<2x8x32xf32> to vector<2x8x8xf32>
    "tpu.trace_start"() <{level = 10 : i32, message = "bqd,bkd->bqk"}> : () -> ()
    %cst_89 = arith.constant dense<0.000000e+00> : vector<2x8x8xf32>
    %285 = tpu.matmul %282, %283, %cst_89 {dimension_numbers = #tpu.dot_dimension_numbers<[2], [2], [1], [1], [0, 0, 0, 1, 1, 1], [0], [0]>} : vector<2x8x8xf32>, vector<2x8x8xf32>, vector<2x8x8xf32> -> vector<2x8x8xf32>
    "tpu.trace_stop"() : () -> ()
    %cst_90 = arith.constant 0.353553385 : f32
    %286 = vector.broadcast %cst_90 : f32 to vector<2x8x8xf32>
    %287 = arith.mulf %285, %286 : vector<2x8x8xf32>
    %cst_91 = arith.constant dense<0xFF800000> : vector<2x8xf32>
    %288 = vector.multi_reduction <maximumf>, %287, %cst_91 [2] : vector<2x8x8xf32> to vector<2x8xf32>
    %cst_92 = arith.constant 0xFF800000 : f32
    %289 = vector.broadcast %cst_92 : f32 to vector<2x8xf32>
    %290 = arith.maximumf %289, %288 : vector<2x8xf32>
    %291 = vector.shape_cast %290 : vector<2x8xf32> to vector<2x8x1xf32>
    %292 = vector.broadcast %291 : vector<2x8x1xf32> to vector<2x8x8xf32>
    %293 = arith.subf %287, %292 : vector<2x8x8xf32>
    %294 = math.exp %293 : vector<2x8x8xf32>
    %cst_93 = arith.constant dense<0.000000e+00> : vector<2x8xf32>
    %295 = vector.multi_reduction <add>, %294, %cst_93 [2] : vector<2x8x8xf32> to vector<2x8xf32>
    %296 = vector.shape_cast %295 : vector<2x8xf32> to vector<2x8x1xf32>
    %297 = vector.broadcast %296 : vector<2x8x1xf32> to vector<2x8x8xf32>
    %298 = arith.divf %294, %297 : vector<2x8x8xf32>
    "tpu.trace_start"() <{level = 10 : i32, message = "bqk,bkd->bqd"}> : () -> ()
    %cst_94 = arith.constant dense<0.000000e+00> : vector<2x8x8xf32>
    %299 = tpu.matmul %298, %284, %cst_94 {dimension_numbers = #tpu.dot_dimension_numbers<[2], [1], [1], [2], [0, 0, 0, 1, 1, 2], [0], [0]>} : vector<2x8x8xf32>, vector<2x8x8xf32>, vector<2x8x8xf32> -> vector<2x8x8xf32>
    "tpu.trace_stop"() : () -> ()
    %300 = vector.shape_cast %299 : vector<2x8x8xf32> to vector<16x8xf32>
    %301 = vector.extract_strided_slice %235 {offsets = [16, 0], sizes = [8, 32], strides = [1, 1]} : vector<32x32xf32> to vector<8x32xf32>
    %cst_95 = arith.constant dense<0.000000e+00> : vector<16x32xf32>
    %302 = tpu.matmul %300, %301, %cst_95 {dimension_numbers = #tpu.dot_dimension_numbers<[1], [0], [0], [1], [0, 0, 1, 1], [], []>} : vector<16x8xf32>, vector<8x32xf32>, vector<16x32xf32> -> vector<16x32xf32>
    %303 = arith.addf %281, %302 : vector<16x32xf32>
    %304 = vector.extract_strided_slice %220 {offsets = [0, 0, 24], sizes = [2, 8, 8], strides = [1, 1, 1]} : vector<2x8x32xf32> to vector<2x8x8xf32>
    %305 = vector.extract_strided_slice %227 {offsets = [0, 0, 24], sizes = [2, 8, 8], strides = [1, 1, 1]} : vector<2x8x32xf32> to vector<2x8x8xf32>
    %306 = vector.extract_strided_slice %234 {offsets = [0, 0, 24], sizes = [2, 8, 8], strides = [1, 1, 1]} : vector<2x8x32xf32> to vector<2x8x8xf32>
    "tpu.trace_start"() <{level = 10 : i32, message = "bqd,bkd->bqk"}> : () -> ()
    %cst_96 = arith.constant dense<0.000000e+00> : vector<2x8x8xf32>
    %307 = tpu.matmul %304, %305, %cst_96 {dimension_numbers = #tpu.dot_dimension_numbers<[2], [2], [1], [1], [0, 0, 0, 1, 1, 1], [0], [0]>} : vector<2x8x8xf32>, vector<2x8x8xf32>, vector<2x8x8xf32> -> vector<2x8x8xf32>
    "tpu.trace_stop"() : () -> ()
    %cst_97 = arith.constant 0.353553385 : f32
    %308 = vector.broadcast %cst_97 : f32 to vector<2x8x8xf32>
    %309 = arith.mulf %307, %308 : vector<2x8x8xf32>
    %cst_98 = arith.constant dense<0xFF800000> : vector<2x8xf32>
    %310 = vector.multi_reduction <maximumf>, %309, %cst_98 [2] : vector<2x8x8xf32> to vector<2x8xf32>
    %cst_99 = arith.constant 0xFF800000 : f32
    %311 = vector.broadcast %cst_99 : f32 to vector<2x8xf32>
    %312 = arith.maximumf %311, %310 : vector<2x8xf32>
    %313 = vector.shape_cast %312 : vector<2x8xf32> to vector<2x8x1xf32>
    %314 = vector.broadcast %313 : vector<2x8x1xf32> to vector<2x8x8xf32>
    %315 = arith.subf %309, %314 : vector<2x8x8xf32>
    %316 = math.exp %315 : vector<2x8x8xf32>
    %cst_100 = arith.constant dense<0.000000e+00> : vector<2x8xf32>
    %317 = vector.multi_reduction <add>, %316, %cst_100 [2] : vector<2x8x8xf32> to vector<2x8xf32>
    %318 = vector.shape_cast %317 : vector<2x8xf32> to vector<2x8x1xf32>
    %319 = vector.broadcast %318 : vector<2x8x1xf32> to vector<2x8x8xf32>
    %320 = arith.divf %316, %319 : vector<2x8x8xf32>
    "tpu.trace_start"() <{level = 10 : i32, message = "bqk,bkd->bqd"}> : () -> ()
    %cst_101 = arith.constant dense<0.000000e+00> : vector<2x8x8xf32>
    %321 = tpu.matmul %320, %306, %cst_101 {dimension_numbers = #tpu.dot_dimension_numbers<[2], [1], [1], [2], [0, 0, 0, 1, 1, 2], [0], [0]>} : vector<2x8x8xf32>, vector<2x8x8xf32>, vector<2x8x8xf32> -> vector<2x8x8xf32>
    "tpu.trace_stop"() : () -> ()
    %322 = vector.shape_cast %321 : vector<2x8x8xf32> to vector<16x8xf32>
    %323 = vector.extract_strided_slice %235 {offsets = [24, 0], sizes = [8, 32], strides = [1, 1]} : vector<32x32xf32> to vector<8x32xf32>
    %cst_102 = arith.constant dense<0.000000e+00> : vector<16x32xf32>
    %324 = tpu.matmul %322, %323, %cst_102 {dimension_numbers = #tpu.dot_dimension_numbers<[1], [0], [0], [1], [0, 0, 1, 1], [], []>} : vector<16x8xf32>, vector<8x32xf32>, vector<16x32xf32> -> vector<16x32xf32>
    %325 = arith.addf %303, %324 : vector<16x32xf32>
    %326 = vector.broadcast %236 : vector<1x32xf32> to vector<16x32xf32>
    %327 = arith.addf %325, %326 : vector<16x32xf32>
    %328 = vector.shape_cast %1 : vector<2x8x32xf32> to vector<16x32xf32>
    %329 = arith.addf %328, %327 : vector<16x32xf32>
    %c0_103 = arith.constant 0 : index
    %c0_104 = arith.constant 0 : index
    %330 = vector.load %arg13[%c0_103, %c0_104] : memref<1x32xf32, #tpu.memory_space<vmem>>, vector<1x32xf32>
    %c0_105 = arith.constant 0 : index
    %c0_106 = arith.constant 0 : index
    %331 = vector.load %arg14[%c0_105, %c0_106] : memref<1x32xf32, #tpu.memory_space<vmem>>, vector<1x32xf32>
    %cst_107 = arith.constant dense<0.000000e+00> : vector<16xf32>
    %332 = vector.multi_reduction <add>, %329, %cst_107 [1] : vector<16x32xf32> to vector<16xf32>
    %333 = vector.shape_cast %332 : vector<16xf32> to vector<16x1xf32>
    %cst_108 = arith.constant 3.200000e+01 : f32
    %334 = vector.broadcast %cst_108 : f32 to vector<16x1xf32>
    %335 = arith.divf %333, %334 : vector<16x1xf32>
    %336 = vector.broadcast %335 : vector<16x1xf32> to vector<16x32xf32>
    %337 = arith.subf %329, %336 : vector<16x32xf32>
    %338 = arith.mulf %337, %337 : vector<16x32xf32>
    %cst_109 = arith.constant dense<0.000000e+00> : vector<16xf32>
    %339 = vector.multi_reduction <add>, %338, %cst_109 [1] : vector<16x32xf32> to vector<16xf32>
    %340 = vector.shape_cast %339 : vector<16xf32> to vector<16x1xf32>
    %cst_110 = arith.constant 3.200000e+01 : f32
    %341 = vector.broadcast %cst_110 : f32 to vector<16x1xf32>
    %342 = arith.divf %340, %341 : vector<16x1xf32>
    %343 = vector.broadcast %335 : vector<16x1xf32> to vector<16x32xf32>
    %344 = arith.subf %329, %343 : vector<16x32xf32>
    %cst_111 = arith.constant 9.99999974E-6 : f32
    %345 = vector.broadcast %cst_111 : f32 to vector<16x1xf32>
    %346 = arith.addf %342, %345 : vector<16x1xf32>
    %347 = math.rsqrt %346 : vector<16x1xf32>
    %348 = vector.broadcast %347 : vector<16x1xf32> to vector<16x32xf32>
    %349 = arith.mulf %344, %348 : vector<16x32xf32>
    %350 = vector.broadcast %330 : vector<1x32xf32> to vector<16x32xf32>
    %351 = arith.mulf %349, %350 : vector<16x32xf32>
    %352 = vector.broadcast %331 : vector<1x32xf32> to vector<16x32xf32>
    %353 = arith.addf %351, %352 : vector<16x32xf32>
    %c0_112 = arith.constant 0 : index
    %c0_113 = arith.constant 0 : index
    %354 = vector.load %arg15[%c0_112, %c0_113] : memref<32x64xf32, #tpu.memory_space<vmem>>, vector<32x64xf32>
    %cst_114 = arith.constant dense<0.000000e+00> : vector<16x64xf32>
    %355 = tpu.matmul %353, %354, %cst_114 {dimension_numbers = #tpu.dot_dimension_numbers<[1], [0], [0], [1], [0, 0, 1, 1], [], []>} : vector<16x32xf32>, vector<32x64xf32>, vector<16x64xf32> -> vector<16x64xf32>
    %c0_115 = arith.constant 0 : index
    %c0_116 = arith.constant 0 : index
    %356 = vector.load %arg16[%c0_115, %c0_116] : memref<1x64xf32, #tpu.memory_space<vmem>>, vector<1x64xf32>
    %357 = vector.broadcast %356 : vector<1x64xf32> to vector<16x64xf32>
    %358 = arith.addf %355, %357 : vector<16x64xf32>
    %cst_117 = arith.constant 0.000000e+00 : f32
    %359 = vector.broadcast %cst_117 : f32 to vector<16x64xf32>
    %360 = arith.maximumf %358, %359 : vector<16x64xf32>
    %c0_118 = arith.constant 0 : index
    %c0_119 = arith.constant 0 : index
    %361 = vector.load %arg17[%c0_118, %c0_119] : memref<64x32xf32, #tpu.memory_space<vmem>>, vector<64x32xf32>
    %cst_120 = arith.constant dense<0.000000e+00> : vector<16x32xf32>
    %362 = tpu.matmul %360, %361, %cst_120 {dimension_numbers = #tpu.dot_dimension_numbers<[1], [0], [0], [1], [0, 0, 1, 1], [], []>} : vector<16x64xf32>, vector<64x32xf32>, vector<16x32xf32> -> vector<16x32xf32>
    %c0_121 = arith.constant 0 : index
    %c0_122 = arith.constant 0 : index
    %363 = vector.load %arg18[%c0_121, %c0_122] : memref<1x32xf32, #tpu.memory_space<vmem>>, vector<1x32xf32>
    %364 = vector.broadcast %363 : vector<1x32xf32> to vector<16x32xf32>
    %365 = arith.addf %362, %364 : vector<16x32xf32>
    %366 = arith.addf %353, %365 : vector<16x32xf32>
    %c0_123 = arith.constant 0 : index
    %c0_124 = arith.constant 0 : index
    %367 = vector.load %arg19[%c0_123, %c0_124] : memref<1x32xf32, #tpu.memory_space<vmem>>, vector<1x32xf32>
    %c0_125 = arith.constant 0 : index
    %c0_126 = arith.constant 0 : index
    %368 = vector.load %arg20[%c0_125, %c0_126] : memref<1x32xf32, #tpu.memory_space<vmem>>, vector<1x32xf32>
    %cst_127 = arith.constant dense<0.000000e+00> : vector<16xf32>
    %369 = vector.multi_reduction <add>, %366, %cst_127 [1] : vector<16x32xf32> to vector<16xf32>
    %370 = vector.shape_cast %369 : vector<16xf32> to vector<16x1xf32>
    %cst_128 = arith.constant 3.200000e+01 : f32
    %371 = vector.broadcast %cst_128 : f32 to vector<16x1xf32>
    %372 = arith.divf %370, %371 : vector<16x1xf32>
    %373 = vector.broadcast %372 : vector<16x1xf32> to vector<16x32xf32>
    %374 = arith.subf %366, %373 : vector<16x32xf32>
    %375 = arith.mulf %374, %374 : vector<16x32xf32>
    %cst_129 = arith.constant dense<0.000000e+00> : vector<16xf32>
    %376 = vector.multi_reduction <add>, %375, %cst_129 [1] : vector<16x32xf32> to vector<16xf32>
    %377 = vector.shape_cast %376 : vector<16xf32> to vector<16x1xf32>
    %cst_130 = arith.constant 3.200000e+01 : f32
    %378 = vector.broadcast %cst_130 : f32 to vector<16x1xf32>
    %379 = arith.divf %377, %378 : vector<16x1xf32>
    %380 = vector.broadcast %372 : vector<16x1xf32> to vector<16x32xf32>
    %381 = arith.subf %366, %380 : vector<16x32xf32>
    %cst_131 = arith.constant 9.99999974E-6 : f32
    %382 = vector.broadcast %cst_131 : f32 to vector<16x1xf32>
    %383 = arith.addf %379, %382 : vector<16x1xf32>
    %384 = math.rsqrt %383 : vector<16x1xf32>
    %385 = vector.broadcast %384 : vector<16x1xf32> to vector<16x32xf32>
    %386 = arith.mulf %381, %385 : vector<16x32xf32>
    %387 = vector.broadcast %367 : vector<1x32xf32> to vector<16x32xf32>
    %388 = arith.mulf %386, %387 : vector<16x32xf32>
    %389 = vector.broadcast %368 : vector<1x32xf32> to vector<16x32xf32>
    %390 = arith.addf %388, %389 : vector<16x32xf32>
    %391 = vector.shape_cast %390 : vector<16x32xf32> to vector<2x8x32xf32>
    %c0_132 = arith.constant 0 : index
    %c0_133 = arith.constant 0 : index
    %c0_134 = arith.constant 0 : index
    %392 = vector.load %arg21[%c0_132, %c0_133, %c0_134] : memref<2x8x32xf32, #tpu.memory_space<vmem>>, vector<2x8x32xf32>
    tpu.vector_store %arg21[%c0_132, %c0_133, %c0_134], %391 {strides = array<i32>} : memref<2x8x32xf32, #tpu.memory_space<vmem>>, vector<2x8x32xf32>,
    return
  }
  func.func @transform_0(%arg0: i32) -> (i32, i32, i32) {
    %c0_i32 = arith.constant 0 : i32
    %c0_i32_0 = arith.constant 0 : i32
    %c0_i32_1 = arith.constant 0 : i32
    return %arg0, %c0_i32, %c0_i32_0 : i32, i32, i32
  }
  func.func @transform_1(%arg0: i32) -> (i32, i32, i32) {
    %c0_i32 = arith.constant 0 : i32
    %c0_i32_0 = arith.constant 0 : i32
    %c0_i32_1 = arith.constant 0 : i32
    return %arg0, %c0_i32, %c0_i32_0 : i32, i32, i32
  }
  func.func @transform_2(%arg0: i32) -> (i32, i32, i32, i32) {
    %c0_i32 = arith.constant 0 : i32
    %c0_i32_0 = arith.constant 0 : i32
    %c0_i32_1 = arith.constant 0 : i32
    %c0_i32_2 = arith.constant 0 : i32
    return %arg0, %c0_i32, %c0_i32_0, %c0_i32_1 : i32, i32, i32, i32
  }
  func.func @transform_3(%arg0: i32) -> (i32, i32) {
    %c0_i32 = arith.constant 0 : i32
    %c0_i32_0 = arith.constant 0 : i32
    %c0_i32_1 = arith.constant 0 : i32
    return %c0_i32, %c0_i32_0 : i32, i32
  }
  func.func @transform_4(%arg0: i32) -> (i32, i32) {
    %c0_i32 = arith.constant 0 : i32
    %c0_i32_0 = arith.constant 0 : i32
    %c0_i32_1 = arith.constant 0 : i32
    return %c0_i32, %c0_i32_0 : i32, i32
  }
  func.func @transform_5(%arg0: i32) -> (i32, i32) {
    %c0_i32 = arith.constant 0 : i32
    %c0_i32_0 = arith.constant 0 : i32
    %c0_i32_1 = arith.constant 0 : i32
    return %c0_i32, %c0_i32_0 : i32, i32
  }
  func.func @transform_6(%arg0: i32) -> (i32, i32) {
    %c0_i32 = arith.constant 0 : i32
    %c0_i32_0 = arith.constant 0 : i32
    %c0_i32_1 = arith.constant 0 : i32
    return %c0_i32, %c0_i32_0 : i32, i32
  }
  func.func @transform_7(%arg0: i32) -> (i32, i32) {
    %c0_i32 = arith.constant 0 : i32
    %c0_i32_0 = arith.constant 0 : i32
    %c0_i32_1 = arith.constant 0 : i32
    return %c0_i32, %c0_i32_0 : i32, i32
  }
  func.func @transform_8(%arg0: i32) -> (i32, i32) {
    %c0_i32 = arith.constant 0 : i32
    %c0_i32_0 = arith.constant 0 : i32
    %c0_i32_1 = arith.constant 0 : i32
    return %c0_i32, %c0_i32_0 : i32, i32
  }
  func.func @transform_9(%arg0: i32) -> (i32, i32) {
    %c0_i32 = arith.constant 0 : i32
    %c0_i32_0 = arith.constant 0 : i32
    %c0_i32_1 = arith.constant 0 : i32
    return %c0_i32, %c0_i32_0 : i32, i32
  }
  func.func @transform_10(%arg0: i32) -> (i32, i32) {
    %c0_i32 = arith.constant 0 : i32
    %c0_i32_0 = arith.constant 0 : i32
    %c0_i32_1 = arith.constant 0 : i32
    return %c0_i32, %c0_i32_0 : i32, i32
  }
  func.func @transform_11(%arg0: i32) -> (i32, i32) {
    %c0_i32 = arith.constant 0 : i32
    %c0_i32_0 = arith.constant 0 : i32
    %c0_i32_1 = arith.constant 0 : i32
    return %c0_i32, %c0_i32_0 : i32, i32
  }
  func.func @transform_12(%arg0: i32) -> (i32, i32) {
    %c0_i32 = arith.constant 0 : i32
    %c0_i32_0 = arith.constant 0 : i32
    %c0_i32_1 = arith.constant 0 : i32
    return %c0_i32, %c0_i32_0 : i32, i32
  }
  func.func @transform_13(%arg0: i32) -> (i32, i32) {
    %c0_i32 = arith.constant 0 : i32
    %c0_i32_0 = arith.constant 0 : i32
    %c0_i32_1 = arith.constant 0 : i32
    return %c0_i32, %c0_i32_0 : i32, i32
  }
  func.func @transform_14(%arg0: i32) -> (i32, i32) {
    %c0_i32 = arith.constant 0 : i32
    %c0_i32_0 = arith.constant 0 : i32
    %c0_i32_1 = arith.constant 0 : i32
    return %c0_i32, %c0_i32_0 : i32, i32
  }
  func.func @transform_15(%arg0: i32) -> (i32, i32) {
    %c0_i32 = arith.constant 0 : i32
    %c0_i32_0 = arith.constant 0 : i32
    %c0_i32_1 = arith.constant 0 : i32
    return %c0_i32, %c0_i32_0 : i32, i32
  }
  func.func @transform_16(%arg0: i32) -> (i32, i32) {
    %c0_i32 = arith.constant 0 : i32
    %c0_i32_0 = arith.constant 0 : i32
    %c0_i32_1 = arith.constant 0 : i32
    return %c0_i32, %c0_i32_0 : i32, i32
  }
  func.func @transform_17(%arg0: i32) -> (i32, i32) {
    %c0_i32 = arith.constant 0 : i32
    %c0_i32_0 = arith.constant 0 : i32
    %c0_i32_1 = arith.constant 0 : i32
    return %c0_i32, %c0_i32_0 : i32, i32
  }
  func.func @transform_18(%arg0: i32) -> (i32, i32) {
    %c0_i32 = arith.constant 0 : i32
    %c0_i32_0 = arith.constant 0 : i32
    %c0_i32_1 = arith.constant 0 : i32
    return %c0_i32, %c0_i32_0 : i32, i32
  }
  func.func @transform_19(%arg0: i32) -> (i32, i32) {
    %c0_i32 = arith.constant 0 : i32
    %c0_i32_0 = arith.constant 0 : i32
    %c0_i32_1 = arith.constant 0 : i32
    return %c0_i32, %c0_i32_0 : i32, i32
  }
  func.func @transform_20(%arg0: i32) -> (i32, i32, i32) {
    %c0_i32 = arith.constant 0 : i32
    %c0_i32_0 = arith.constant 0 : i32
    %c0_i32_1 = arith.constant 0 : i32
    return %arg0, %c0_i32, %c0_i32_0 : i32, i32, i32
  }
}

</mosaic_0001>

<bundles_post_ra>
// kernel: decoder_layer_forward.1
= control target key start
LH: loop header
LB: loop body
LE: loop exit
PB: predicated region body
PF: predicated region fallthrough
CT: control target
= control target key end

     0   :  { %s6178_s0 = inlined_call_operand.vmem [shape: f32[2,8,32], index: 0, kind: input, shape index: {}]   ;;  %s6179_s1 = inlined_call_operand.vmem [shape: f32[2,8,32], index: 1, kind: input, shape index: {}]   ;;  %s6180_s2 = inlined_call_operand.vmem [shape: f32[2,5,8,32], index: 2, kind: input, shape index: {}]   ;;  %s6181_s3 = inlined_call_operand.vmem [shape: f32[32,128], index: 3, kind: input, shape index: {}]   ;;  %s6182_s4 = inlined_call_operand.vmem [shape: f32[1,128], index: 4, kind: input, shape index: {}]   ;;  %s6183_s5 = inlined_call_operand.vmem [shape: f32[1,32], index: 5, kind: input, shape index: {}]   ;;  %s6184_s6 = inlined_call_operand.vmem [shape: f32[1,32], index: 6, kind: input, shape index: {}]   ;;  %s6185_s7 = inlined_call_operand.vmem [shape: f32[32,5], index: 7, kind: input, shape index: {}]   ;;  %s6186_s8 = inlined_call_operand.vmem [shape: f32[32,5], index: 8, kind: input, shape index: {}]   ;;  %s6187_s9 = inlined_call_operand.vmem [shape: f32[1,5], index: 9, kind: input, shape index: {}]   ;;  %s6188_s10 = inlined_call_operand.vmem [shape: f32[32,128], index: 10, kind: input, shape index: {}]   ;;  %s6189_s11 = inlined_call_operand.vmem [shape: f32[1,128], index: 11, kind: input, shape index: {}]   ;;  %s6190_s12 = inlined_call_operand.vmem [shape: f32[1,32], index: 12, kind: input, shape index: {}]   ;;  %s6191_s13 = inlined_call_operand.vmem [shape: f32[1,32], index: 13, kind: input, shape index: {}]   ;;  %s6192_s14 = inlined_call_operand.vmem [shape: f32[32,64], index: 14, kind: input, shape index: {}]   ;;  %s6193_s15 = inlined_call_operand.vmem [shape: f32[1,64], index: 15, kind: input, shape index: {}]   ;;  %s6194_s16 = inlined_call_operand.vmem [shape: f32[64,32], index: 16, kind: input, shape index: {}]   ;;  %s6195_s17 = inlined_call_operand.vmem [shape: f32[1,32], index: 17, kind: input, shape index: {}]   ;;  %s6196_s18 = inlined_call_operand.vmem [shape: f32[1,32], index: 18, kind: input, shape index: {}]   ;;  %s6197_s19 = inlined_call_operand.vmem [shape: f32[1,32], index: 19, kind: input, shape index: {}]   ;;  %s6198_s20 = inlined_call_operand.hbm [shape: f32[2,8,32], index: 20, kind: output, shape index: {}]  }
   0x1   :  { %6203 = sst [smem:[#allocation5_spill]] %s6178_s0 }
   0x2   :  { %6204 = sst [smem:[#allocation6_spill]] %s6179_s1 }
   0x3   :  { %6205 = sst [smem:[#allocation7_spill]] %s6180_s2 }
   0x4   :  { %6206 = sst [smem:[#allocation8_spill]] %s6181_s3 }
   0x5   :  { %6207 = sst [smem:[#allocation9_spill]] %s6182_s4 }
   0x6   :  { %s6208_s23 = sld [smem:[#allocation8_spill]]  ;;  %vm81_vm0 = vcmask 261120   ;;  %s6209_s29 = sld [smem:[#allocation5_spill]] }
   0x7   :  { %s6210_s21 = sld [smem:[#allocation9_spill]] }
   0xc   :  { %v5558_v0 = vld [vmem:[%s6208_s23] sm:$0xff]  ;;  %v5563_v1 = vld [vmem:[%s6208_s23 + $0x8] sm:$0xff]  ;;  %v5568_v2 = vld [vmem:[%s6208_s23 + $0x10] sm:$0xff] }
   0xd   :  { %v5276_v3 = vpack.i.bf16 %v5563_v1, %v5558_v0  ;;  %v5575_v4 = vld [vmem:[%s6208_s23 + $0x18] sm:$0xff]  ;;  %v5158_v5 = vpack.c.bf16 %v5563_v1, %v5558_v0  ;;  %v5582_v6 = vld [vmem:[%s6209_s29] sm:$0xff] }
   0xe   :  { %v5162_v7 = vpack.c.bf16 %v5575_v4, %v5568_v2  ;;  %4848 = vmatprep.mubr.msk.f32.mxu1 %vm81_vm0, %v5582_v6  ;;  %v5591_v8 = vld [vmem:[%s6210_s21] ss:$0 sm:$0xff]  ;;  %4870 = vmatprep.mubr.msk.f32.mxu0 %vm81_vm0, %v5582_v6 }
   0xf   :  { %25 = vsyncpa [#allocation3], 0  ;;  %s5434_s1 = smov 96   ;;  %v5281_v9 = vpack.i.bf16 %v5575_v4, %v5568_v2  ;;  %5159 = vmatprep.subr.bf16.mxu1 %v5158_v5  ;;  %v5604_v10 = vld [vmem:[%s6209_s29 + $0x8] sm:$0xff]  ;;  %v5435_v19 = vmov 0.0   ;;  %vm5436_vm1 = vmmov 0  }
  0x10   :  { %5277 = vrot.lane.b32.xlu0 %v5276_v3, %s5434_s1  ;;  %5161 = vmatpush3.bf16.msra.mxu1 %v5158_v5  ;;  %s5437_s24 = smov 64   ;;  %vm347_vm2 = vcmask 64512   ;;  %s5438_s2 = smov 120   ;;  %vm2249_vm3 = vcmask 39936   ;;  %vm4447_vm4 = vcmask 523264  }
  0x11   :  { %179 = vrot.lane.b32.xlu1 %v5591_v8, %s5434_s1  ;;  %5163 = vmatprep.subr.bf16.mxu1 %v5162_v7  ;;  %s5439_s25 = smov 112   ;;  %s5440_s3 = smov 32  }
  0x12   :  { %s5441_s26 = smov 104   ;;  %s6211_s0 = sld [smem:[#allocation6_spill]] }
  0x14   :  { %5282 = vrot.lane.b32.xlu0 %v5281_v9, %s5434_s1  ;;  %5165 = vmatpush3.bf16.msra.mxu1 %v5162_v7 }
  0x15   :  { %5287 = vrot.lane.b32.xlu1 %v5276_v3, %s5437_s24 }
  0x17   :  { %4849 = vmatmul.mubr.msk.f32.vlgmr.msra.gmra.mrb[0].mxu1 %vm81_vm0, %v5604_v10 }
  0x18   :  { %4859 = vmatprep.mubr.msk.f32.mxu1 %vm81_vm0, %v5582_v6  ;;  %5292 = vrot.lane.b32.xlu0 %v5281_v9, %s5437_s24 }
  0x82   :  { %v5278_v11 = vpop.permute.xlu0 %5277 }
  0x83   :  { %v5280_v12 = vunpack.i.h.bf16 %v5278_v11  ;;  %v5279_v13 = vunpack.i.l.bf16 %v5278_v11  ;;  %v180_v22 = vpop.permute.xlu1 %179 }
  0x85   :  { %v5166_v14 = vpack.c.bf16 %v5280_v12, %v5279_v13 }
  0x86   :  { %v5283_v15 = vpop.permute.xlu0 %5282 }
  0x87   :  { %v5285_v16 = vunpack.i.h.bf16 %v5283_v15  ;;  %v5284_v17 = vunpack.i.l.bf16 %v5283_v15  ;;  %5167 = vmatprep.subr.bf16.mxu1 %v5166_v14  ;;  %v5288_v29 = vpop.permute.xlu1 %5287 }
  0x88   :  { %5169 = vmatpush3.bf16.msra.mxu1 %v5166_v14  ;;  %v5290_v31 = vunpack.i.h.bf16 %v5288_v29  ;;  %v5289_v32 = vunpack.i.l.bf16 %v5288_v29 }
  0x89   :  { %v5170_v18 = vpack.c.bf16 %v5285_v16, %v5284_v17 }
  0x8a   :  { %v5293_v30 = vpop.permute.xlu0 %5292  ;;  %v5174_v35 = vpack.c.bf16 %v5290_v31, %v5289_v32 }
  0x8b   :  { %5171 = vmatprep.subr.bf16.mxu1 %v5170_v18  ;;  %v5295_v33 = vunpack.i.h.bf16 %v5293_v30  ;;  %v5294_v34 = vunpack.i.l.bf16 %v5293_v30 }
  0x8c   :  { %5173 = vmatpush3.bf16.msra.mxu1 %v5170_v18  ;;  %5175 = vmatprep.subr.bf16.mxu0 %v5174_v35 }
  0x8d   :  { %4873 = vmatprep.subr.mxu1 %v5435_v19  ;;  %v5178_v36 = vpack.c.bf16 %v5295_v33, %v5294_v34  ;;  %5177 = vmatpush3.bf16.msra.mxu0 %v5174_v35 }
  0x8f   :  { %4860 = vmatmul.mubr.msk.f32.vlgmr.msra.gmra.mrb[2].mxu1 %vm81_vm0, %v5604_v10  ;;  %5179 = vmatprep.subr.bf16.mxu0 %v5178_v36 }
  0x90   :  { %4875 = vmatprep.mubr.msk.f32.mxu1 %vm5436_vm1, %v5435_v19 }
  0x91   :  { %5181 = vmatpush3.bf16.msra.mxu0 %v5178_v36 }
  0x92   :  { %4883 = vmatprep.subr.mxu0 %v5435_v19 }
  0x94   :  { %4871 = vmatmul.mubr.msk.f32.vlgmr.msra.gmra.mrb[0].mxu0 %vm81_vm0, %v5604_v10 }
  0x95   :  { %4885 = vmatprep.mubr.msk.f32.mxu0 %vm5436_vm1, %v5435_v19 }
  0xea   :  { %v4850_v20 = vpop.f32.mrb[0].mxu1 }
  0xeb   :  { %v154_v21 = vpop.f32.mrb[1].mxu1  ;;  %v5634_v28 = vadd.f32 %v4850_v20, %v5591_v8 }
  0xec   :  { %v5622_v26 = vadd.f32 %v5591_v8, %v154_v21 }
 0x162   :  { %v4861_v23 = vpop.f32.mrb[2].mxu1 }
 0x163   :  { %v248_v24 = vpop.f32.mrb[3].mxu1  ;;  %v5625_v27 = vadd.f32 %v4861_v23, %v180_v22 }
 0x164   :  { %v5617_v25 = vadd.f32 %v248_v24, %v180_v22 }
 0x166   :  { %4874 = vmatpush3.xpose.msk.msra.mxu1 %vm347_vm2, %v5617_v25 }
 0x167   :  { %4878 = vmatprep.subr.mxu1 %v5435_v19  ;;  %v4872_v48 = vpop.f32.mrb[0].mxu0 }
 0x168   :  { %v338_v49 = vpop.f32.mrb[1].mxu0 }
 0x169   :  { %4876 = vmatmul.mubr.msk.f32.vlgmr.msra.gmra.mrb[4].mxu1 %vm347_vm2, %v5622_v26 }
 0x16a   :  { %4879 = vmatpush3.xpose.msk.msra.mxu1 %vm347_vm2, %v5625_v27  ;;  %4880 = vmatprep.mubr.msk.f32.mxu1 %vm5436_vm1, %v5435_v19 }
 0x16b   :  { %4888 = vmatprep.subr.mxu1 %v5435_v19 }
 0x16d   :  { %4881 = vmatmul.mubr.msk.f32.vlgmr.msra.gmra.mrb[6].mxu1 %vm347_vm2, %v5634_v28 }
 0x16e   :  { %4890 = vmatprep.mubr.msk.f32.mxu1 %vm5436_vm1, %v5435_v19 }
 0x23c   :  { %v420_v37 = vpop.f32.mrb[4].mxu1 }
 0x23d   :  { %v4877_v38 = vpop.f32.mrb[5].mxu1  ;;  %v500_v50 = vmul.f32 0.35355338, %v420_v37 }
 0x23f   :  { %v502_v51 = vsel %vm347_vm2, %v500_v50, -inf }
 0x240   :  { %v496_v39 = vpop.f32.mrb[6].mxu1 }
 0x241   :  { %v501_v40 = vmul.f32 0.35355338, %v496_v39  ;;  %v4882_v41 = vpop.f32.mrb[7].mxu1 }
 0x243   :  { %v505_v42 = vsel %vm347_vm2, %v501_v40, -inf }
 0x244   :  { %506 = vmax.xlane.f32.xlu1 %v505_v42 }
 0x255   :  { %750 = vrot.lane.b32.xlu1 %v5625_v27, %s5438_s2 }
 0x259   :  { %748 = vrot.lane.b32.xlu1 %v5634_v28, %s5438_s2 }
 0x2d1   :  { %v507_v43 = vpop.xlane.xlu1 %506 }
 0x2d2   :  { %v509_v44 = vsub.f32 %v501_v40, %v507_v43 }
 0x2d4   :  { %v512_v45 = vmul.f32 1.442695, %v509_v44 }
 0x2d5   :  { %v751_v57 = vpop.permute.xlu1 %750 }
 0x2d6   :  { %5326 = vpow2.f32 %v512_v45 }
 0x2d9   :  { %v749_v59 = vpop.permute.xlu1 %748 }
 0x2e0   :  { %v5327_v46 = vpop.eup %5326 }
 0x2e1   :  { %v517_v47 = vsel %vm347_vm2, %v5327_v46, 0.0 }
 0x2e2   :  { %518 = vadd.xlane.f32.xlu0 %v517_v47 }
 0x2f8   :  { %269 = vrot.lane.b32.xlu0 %v5591_v8, %s5437_s24 }
 0x317   :  { %503 = vmax.xlane.f32.xlu0 %v502_v51 }
 0x32d   :  { %672 = vrot.lane.b32.xlu0 %v5617_v25, %s5438_s2 }
 0x36f   :  { %v519_v52 = vpop.xlane.xlu0 %518 }
 0x370   :  { %5328 = vrcp.f32 %v519_v52 }
 0x373   :  { %v270_v53 = vpop.permute.xlu0 %269 }
 0x374   :  { %v5657_v54 = vadd.f32 %v4872_v48, %v270_v53  ;;  %v5659_v55 = vadd.f32 %v338_v49, %v270_v53 }
 0x376   :  { %4889 = vmatpush3.msra.mxu1 %v5657_v54  ;;  %4884 = vmatpush3.msra.mxu0 %v5659_v55 }
 0x377   :  { %4898 = vmatprep.subr.mxu1 %v5435_v19  ;;  %4893 = vmatprep.subr.mxu0 %v5435_v19 }
 0x37a   :  { %v5329_v56 = vpop.eup %5328 }
 0x37b   :  { %v523_v58 = vmul.f32 %v5329_v56, %v5327_v46 }
 0x37d   :  { %4891 = vmatmul.mubr.msk.f32.vlgmr.msra.gmra.mrb[8].mxu1 %vm347_vm2, %v523_v58 }
 0x37e   :  { %4899 = vmatpush3.xpose.msk.msra.mxu1 %vm347_vm2, %v751_v57  ;;  %4900 = vmatprep.mubr.msk.f32.mxu1 %vm5436_vm1, %v5435_v19 }
 0x37f   :  { %4908 = vmatprep.subr.mxu1 %v5435_v19 }
 0x381   :  { %4901 = vmatmul.mubr.msk.f32.vlgmr.msra.gmra.mrb[10].mxu1 %vm347_vm2, %v749_v59 }
 0x382   :  { %4910 = vmatprep.mubr.msk.f32.mxu1 %vm5436_vm1, %v5435_v19 }
 0x3a4   :  { %v504_v60 = vpop.xlane.xlu0 %503 }
 0x3a5   :  { %v508_v61 = vsub.f32 %v500_v50, %v504_v60 }
 0x3a7   :  { %v510_v62 = vmul.f32 1.442695, %v508_v61 }
 0x3a8   :  { %v673_v11 = vpop.permute.xlu0 %672 }
 0x3a9   :  { %5330 = vpow2.f32 %v510_v62 }
 0x3b3   :  { %v5331_v63 = vpop.eup %5330 }
 0x3b4   :  { %v514_v3 = vsel %vm347_vm2, %v5331_v63, 0.0 }
 0x3b5   :  { %515 = vadd.xlane.f32.xlu1 %v514_v3 }
 0x3c6   :  { %670 = vrot.lane.b32.xlu1 %v5622_v26, %s5438_s2 }
 0x3ca   :  { %1174 = vrot.lane.b32.xlu1 %v5617_v25, %s5439_s25 }
 0x442   :  { %v516_v5 = vpop.xlane.xlu1 %515 }
 0x443   :  { %5332 = vrcp.f32 %v516_v5 }
 0x446   :  { %v671_v14 = vpop.permute.xlu1 %670 }
 0x44a   :  { %v1175_v36 = vpop.permute.xlu1 %1174 }
 0x44d   :  { %v5333_v7 = vpop.eup %5332 }
 0x44e   :  { %v521_v9 = vmul.f32 %v5333_v7, %v5331_v63 }
 0x450   :  { %4886 = vmatmul.mubr.msk.f32.vlgmr.msra.gmra.mrb[2].mxu0 %vm347_vm2, %v521_v9  ;;  %v5679_v12 = vpop.f32.mrb[8].mxu1 }
 0x451   :  { %4894 = vmatpush3.xpose.msk.msra.mxu0 %vm347_vm2, %v673_v11  ;;  %v4892_v13 = vpop.f32.mrb[9].mxu1  ;;  %4895 = vmatprep.mubr.msk.f32.mxu0 %vm5436_vm1, %v5435_v19 }
 0x452   :  { %4903 = vmatprep.subr.mxu0 %v5435_v19 }
 0x454   :  { %4896 = vmatmul.mubr.msk.f32.vlgmr.msra.gmra.mrb[4].mxu0 %vm347_vm2, %v671_v14  ;;  %v822_v15 = vpop.f32.mrb[10].mxu1 }
 0x455   :  { %v827_v16 = vmul.f32 0.35355338, %v822_v15  ;;  %v4902_v17 = vpop.f32.mrb[11].mxu1  ;;  %4905 = vmatprep.mubr.msk.f32.mxu0 %vm5436_vm1, %v5435_v19 }
 0x457   :  { %v831_v18 = vsel %vm347_vm2, %v827_v16, -inf }
 0x458   :  { %832 = vmax.xlane.f32.xlu0 %v831_v18 }
 0x46e   :  { %928 = vrot.lane.b32.xlu0 %v5657_v54, %s5438_s2 }
 0x472   :  { %1172 = vrot.lane.b32.xlu0 %v5622_v26, %s5439_s25 }
 0x476   :  { %1250 = vrot.lane.b32.xlu0 %v5634_v28, %s5439_s25 }
 0x4e5   :  { %v833_v20 = vpop.xlane.xlu0 %832 }
 0x4e6   :  { %v835_v21 = vsub.f32 %v827_v16, %v833_v20 }
 0x4e8   :  { %v838_v22 = vmul.f32 1.442695, %v835_v21 }
 0x4e9   :  { %v929_v23 = vpop.permute.xlu0 %928 }
 0x4ea   :  { %5334 = vpow2.f32 %v838_v22  ;;  %4909 = vmatpush3.msra.mxu1 %v929_v23 }
 0x4eb   :  { %4923 = vmatprep.subr.mxu1 %v5435_v19 }
 0x4ed   :  { %v1173_v40 = vpop.permute.xlu0 %1172 }
 0x4f1   :  { %v1251_v42 = vpop.permute.xlu0 %1250 }
 0x4f4   :  { %v5335_v24 = vpop.eup %5334 }
 0x4f5   :  { %v843_v29 = vsel %vm347_vm2, %v5335_v24, 0.0 }
 0x4f6   :  { %844 = vadd.xlane.f32.xlu1 %v843_v29 }
 0x507   :  { %1252 = vrot.lane.b32.xlu1 %v5625_v27, %s5439_s25 }
 0x523   :  { %v5699_v30 = vpop.f32.mrb[2].mxu0 }
 0x524   :  { %v4887_v31 = vpop.f32.mrb[3].mxu0 }
 0x527   :  { %v744_v32 = vpop.f32.mrb[4].mxu0 }
 0x528   :  { %v826_v33 = vmul.f32 0.35355338, %v744_v32  ;;  %v4897_v34 = vpop.f32.mrb[5].mxu0 }
 0x52a   :  { %v828_v35 = vsel %vm347_vm2, %v826_v33, -inf }
 0x52b   :  { %829 = vmax.xlane.f32.xlu1 %v828_v35 }
 0x583   :  { %v845_v37 = vpop.xlane.xlu1 %844 }
 0x584   :  { %5336 = vrcp.f32 %v845_v37 }
 0x587   :  { %v1253_v41 = vpop.permute.xlu1 %1252 }
 0x58e   :  { %v5337_v38 = vpop.eup %5336 }
 0x58f   :  { %v849_v39 = vmul.f32 %v5337_v38, %v5335_v24 }
 0x591   :  { %4911 = vmatmul.mubr.msk.f32.vlgmr.msra.gmra.mrb[12].mxu1 %vm347_vm2, %v849_v39 }
 0x592   :  { %4924 = vmatpush3.xpose.msk.msra.mxu1 %vm347_vm2, %v1175_v36  ;;  %4925 = vmatprep.mubr.msk.f32.mxu1 %vm5436_vm1, %v5435_v19 }
 0x593   :  { %4928 = vmatprep.subr.mxu1 %v5435_v19 }
 0x595   :  { %4926 = vmatmul.mubr.msk.f32.vlgmr.msra.gmra.mrb[14].mxu1 %vm347_vm2, %v1173_v40 }
 0x596   :  { %4929 = vmatpush3.xpose.msk.msra.mxu1 %vm347_vm2, %v1253_v41  ;;  %4930 = vmatprep.mubr.msk.f32.mxu1 %vm5436_vm1, %v5435_v19 }
 0x597   :  { %4938 = vmatprep.subr.mxu1 %v5435_v19 }
 0x599   :  { %4931 = vmatmul.mubr.msk.f32.vlgmr.msra.gmra.mrb[16].mxu1 %vm347_vm2, %v1251_v42 }
 0x59a   :  { %4940 = vmatprep.mubr.msk.f32.mxu1 %vm5436_vm1, %v5435_v19 }
 0x5b8   :  { %v830_v43 = vpop.xlane.xlu1 %829 }
 0x5b9   :  { %v834_v44 = vsub.f32 %v826_v33, %v830_v43 }
 0x5bb   :  { %v836_v45 = vmul.f32 1.442695, %v834_v44 }
 0x5bd   :  { %5338 = vpow2.f32 %v836_v45 }
 0x5c7   :  { %v5339_v46 = vpop.eup %5338 }
 0x5c8   :  { %v840_v47 = vsel %vm347_vm2, %v5339_v46, 0.0 }
 0x5c9   :  { %841 = vadd.xlane.f32.xlu0 %v840_v47 }
 0x5df   :  { %851 = vrot.lane.b32.xlu0 %v5659_v55, %s5438_s2 }
 0x5e3   :  { %1088 = vrot.lane.b32.xlu0 %v5558_v0, %s5440_s3 }
 0x5e7   :  { %1352 = vrot.lane.b32.xlu0 %v5659_v55, %s5439_s25 }
 0x5eb   :  { %1428 = vrot.lane.b32.xlu0 %v5657_v54, %s5439_s25 }
 0x5ef   :  { %1504 = vrot.lane.b32.xlu0 %v5568_v2, %s5440_s3 }
 0x5f3   :  { %1670 = vrot.lane.b32.xlu0 %v5625_v27, %s5441_s26 }
 0x5f7   :  { %1668 = vrot.lane.b32.xlu0 %v5634_v28, %s5441_s26 }
 0x656   :  { %v842_v48 = vpop.xlane.xlu0 %841 }
 0x657   :  { %5340 = vrcp.f32 %v842_v48 }
 0x65a   :  { %v852_v49 = vpop.permute.xlu0 %851 }
 0x65b   :  { %4904 = vmatpush3.msra.mxu0 %v852_v49 }
 0x65e   :  { %v1089_v0 = vpop.permute.xlu0 %1088 }
 0x661   :  { %v5341_v50 = vpop.eup %5340 }
 0x662   :  { %v847_v51 = vmul.f32 %v5341_v50, %v5339_v46  ;;  %v1353_v52 = vpop.permute.xlu0 %1352 }
 0x664   :  { %4906 = vmatmul.mubr.msk.f32.vlgmr.msra.gmra.mrb[6].mxu0 %vm347_vm2, %v847_v51  ;;  %v1000_v53 = vpop.f32.mrb[12].mxu1 }
 0x665   :  { %v4912_v56 = vpop.f32.mrb[13].mxu1 }
 0x666   :  { %v1429_v2 = vpop.permute.xlu0 %1428 }
 0x667   :  { %4939 = vmatpush3.msra.mxu1 %v1429_v2 }
 0x668   :  { %v1246_v57 = vpop.f32.mrb[14].mxu1  ;;  %4948 = vmatprep.subr.mxu1 %v5435_v19 }
 0x669   :  { %v1328_v27 = vmul.f32 0.35355338, %v1246_v57  ;;  %v4927_v58 = vpop.f32.mrb[15].mxu1 }
 0x66a   :  { %v1505_v24 = vpop.permute.xlu0 %1504 }
 0x66b   :  { %v1330_v28 = vsel %vm347_vm2, %v1328_v27, -inf }
 0x66c   :  { %1331 = vmax.xlane.f32.xlu1 %v1330_v28  ;;  %v1324_v59 = vpop.f32.mrb[16].mxu1 }
 0x66d   :  { %v1329_v60 = vmul.f32 0.35355338, %v1324_v59  ;;  %v4932_v61 = vpop.f32.mrb[17].mxu1 }
 0x66e   :  { %v1671_v32 = vpop.permute.xlu0 %1670 }
 0x66f   :  { %v1333_v62 = vsel %vm347_vm2, %v1329_v60, -inf }
 0x670   :  { %1334 = vmax.xlane.f32.xlu1 %v1333_v62 }
 0x672   :  { %v1669_v39 = vpop.permute.xlu0 %1668 }
 0x6f9   :  { %v1332_v63 = vpop.xlane.xlu1 %1331 }
 0x6fa   :  { %v1336_v3 = vsub.f32 %v1328_v27, %v1332_v63 }
 0x6fc   :  { %v1338_v5 = vmul.f32 1.442695, %v1336_v3 }
 0x6fd   :  { %v1335_v7 = vpop.xlane.xlu1 %1334 }
 0x6fe   :  { %5342 = vpow2.f32 %v1338_v5  ;;  %v1337_v9 = vsub.f32 %v1329_v60, %v1335_v7 }
 0x700   :  { %v1340_v11 = vmul.f32 1.442695, %v1337_v9 }
 0x702   :  { %5344 = vpow2.f32 %v1340_v11 }
 0x708   :  { %v5343_v13 = vpop.eup %5342 }
 0x709   :  { %v1342_v14 = vsel %vm347_vm2, %v5343_v13, 0.0 }
 0x70a   :  { %1343 = vadd.xlane.f32.xlu1 %v1342_v14 }
 0x70c   :  { %v5345_v15 = vpop.eup %5344 }
 0x70d   :  { %v1345_v16 = vsel %vm347_vm2, %v5345_v15, 0.0 }
 0x70e   :  { %1346 = vadd.xlane.f32.xlu1 %v1345_v16 }
 0x71f   :  { %1004 = vrot.lane.b32.xlu1 %v5563_v1, %s5440_s3 }
 0x723   :  { %1592 = vrot.lane.b32.xlu1 %v5617_v25, %s5441_s26 }
 0x727   :  { %1590 = vrot.lane.b32.xlu1 %v5622_v26, %s5441_s26 }
 0x737   :  { %v923_v17 = vpop.f32.mrb[6].mxu0 }
 0x738   :  { %v4907_v18 = vpop.f32.mrb[7].mxu0  ;;  %4915 = vmatprep.mubr.msk.f32.mxu0 %vm347_vm2, %v923_v17 }
 0x797   :  { %v1344_v20 = vpop.xlane.xlu1 %1343 }
 0x79b   :  { %v1347_v21 = vpop.xlane.xlu1 %1346 }
 0x79c   :  { %5346 = vrcp.f32 %v1347_v21 }
 0x79d   :  { %5348 = vrcp.f32 %v1344_v20 }
 0x79f   :  { %v1005_v22 = vpop.permute.xlu1 %1004 }
 0x7a0   :  { %4913 = vmatprep.subr.mxu0 %v1005_v22 }
 0x7a1   :  { %4914 = vmatpush3.msra.mxu0 %v1005_v22 }
 0x7a2   :  { %4916 = vmatmul.mubr.msk.f32.vlgmr.msra.gmra.mrb[8].mxu0 %vm347_vm2, %v1000_v53  ;;  %4918 = vmatprep.subr.mxu0 %v1089_v0 }
 0x7a3   :  { %4920 = vmatprep.mubr.msk.f32.mxu0 %vm347_vm2, %v5699_v30  ;;  %4919 = vmatpush3.msra.mxu0 %v1089_v0  ;;  %v1593_v25 = vpop.permute.xlu1 %1592 }
 0x7a4   :  { %4933 = vmatprep.subr.mxu0 %v5435_v19 }
 0x7a6   :  { %v5347_v1 = vpop.eup %5346 }
 0x7a7   :  { %v1351_v26 = vmul.f32 %v5347_v1, %v5345_v15  ;;  %v5349_v23 = vpop.eup %5348  ;;  %v1591_v30 = vpop.permute.xlu1 %1590 }
 0x7a8   :  { %v1349_v29 = vmul.f32 %v5349_v23, %v5343_v13  ;;  %v2076_v23 = vld [vmem:[%s6186_s8 + $0x10] sm:$0xff] }
 0x7a9   :  { %4941 = vmatmul.mubr.msk.f32.vlgmr.msra.gmra.mrb[18].mxu1 %vm347_vm2, %v1351_v26 }
 0x7aa   :  { %4949 = vmatpush3.xpose.msk.msra.mxu1 %vm347_vm2, %v1593_v25  ;;  %4921 = vmatmul.mubr.msk.f32.vlgmr.msra.gmra.mrb[8].mxu0 %vm347_vm2, %v5679_v12  ;;  %v2075_v25 = vld [vmem:[%s6186_s8 + $0x8] sm:$0xff] }
 0x7ab   :  { %4934 = vmatpush3.msra.mxu0 %v1353_v52  ;;  %4950 = vmatprep.mubr.msk.f32.mxu1 %vm5436_vm1, %v5435_v19 }
 0x7ac   :  { %4935 = vmatprep.mubr.msk.f32.mxu0 %vm5436_vm1, %v5435_v19  ;;  %4943 = vmatprep.subr.mxu0 %v1505_v24 }
 0x7ad   :  { %4951 = vmatmul.mubr.msk.f32.vlgmr.msra.gmra.mrb[20].mxu1 %vm347_vm2, %v1591_v30  ;;  %4958 = vmatprep.subr.mxu1 %v5435_v19  ;;  %v2070_v30 = vld [vmem:[%s6185_s7] sm:$0xff] }
 0x7ae   :  { %4936 = vmatmul.mubr.msk.f32.vlgmr.msra.gmra.mrb[10].mxu0 %vm347_vm2, %v1349_v29  ;;  %4960 = vmatprep.mubr.msk.f32.mxu1 %vm5436_vm1, %v5435_v19 }
 0x7af   :  { %4944 = vmatpush3.msra.mxu0 %v1505_v24  ;;  %v2077_v24 = vld [vmem:[%s6186_s8 + $0x18] sm:$0xff] }
 0x7b0   :  { %4953 = vmatprep.subr.mxu0 %v5435_v19  ;;  %v5186_v29 = vpack.c.bf16 %v2077_v24, %v2076_v23 }
 0x87c   :  { %v1500_v12 = vpop.f32.mrb[18].mxu1 }
 0x87d   :  { %v4942_v31 = vpop.f32.mrb[19].mxu1 }
 0x880   :  { %v1664_v33 = vpop.f32.mrb[20].mxu1 }
 0x881   :  { %v1746_v34 = vmul.f32 0.35355338, %v1664_v33  ;;  %v1424_v35 = vpop.f32.mrb[10].mxu0  ;;  %v4952_v36 = vpop.f32.mrb[21].mxu1 }
 0x882   :  { %v4937_v37 = vpop.f32.mrb[11].mxu0  ;;  %4945 = vmatprep.mubr.msk.f32.mxu0 %vm347_vm2, %v1424_v35 }
 0x883   :  { %4946 = vmatmul.mubr.msk.f32.vlgmr.msra.gmra.mrb[8].mxu0 %vm347_vm2, %v1500_v12  ;;  %v1748_v38 = vsel %vm347_vm2, %v1746_v34, -inf  ;;  %v2071_v12 = vld [vmem:[%s6185_s7 + $0x8] sm:$0xff] }
 0x884   :  { %4954 = vmatpush3.xpose.msk.msra.mxu0 %vm347_vm2, %v1671_v32  ;;  %1749 = vmax.xlane.f32.xlu1 %v1748_v38  ;;  %v5190_v31 = vpack.c.bf16 %v2071_v12, %v2070_v30  ;;  %v5813_v32 = vld [vmem:[%s6211_s0] sm:$0xff]  ;;  %v5443_v12 = vmov 1  }
 0x885   :  { %4955 = vmatprep.mubr.msk.f32.mxu0 %vm5436_vm1, %v5435_v19  ;;  %4963 = vmatprep.subr.mxu0 %v5435_v19 }
 0x887   :  { %4956 = vmatmul.mubr.msk.f32.vlgmr.msra.gmra.mrb[12].mxu0 %vm347_vm2, %v1669_v39 }
 0x888   :  { %4965 = vmatprep.mubr.msk.f32.mxu0 %vm5436_vm1, %v5435_v19 }
 0x911   :  { %v1750_v40 = vpop.xlane.xlu1 %1749 }
 0x912   :  { %v1754_v41 = vsub.f32 %v1746_v34, %v1750_v40  ;;  %v4632_v40 = vld [vmem:[%s6183_s5] ss:$0 sm:$0xff] }
 0x914   :  { %v1756_v42 = vmul.f32 1.442695, %v1754_v41 }
 0x916   :  { %5350 = vpow2.f32 %v1756_v42 }
 0x920   :  { %v5351_v47 = vpop.eup %5350 }
 0x921   :  { %v1760_v48 = vsel %vm347_vm2, %v5351_v47, 0.0 }
 0x95a   :  { %v1742_v43 = vpop.f32.mrb[12].mxu0 }
 0x95b   :  { %v1747_v44 = vmul.f32 0.35355338, %v1742_v43  ;;  %v4957_v45 = vpop.f32.mrb[13].mxu0 }
 0x95d   :  { %v1751_v46 = vsel %vm347_vm2, %v1747_v44, -inf }
 0x95e   :  { %1752 = vmax.xlane.f32.xlu0 %v1751_v46 }
 0x962   :  { %1761 = vadd.xlane.f32.xlu0 %v1760_v48  ;;  %v2073_v48 = vld [vmem:[%s6185_s7 + $0x18] sm:$0xff] }
 0x978   :  { %1770 = vrot.lane.b32.xlu0 %v5659_v55, %s5441_s26 }
 0x97c   :  { %2008 = vrot.lane.b32.xlu0 %v5591_v8, %s5440_s3 }
 0x9eb   :  { %v1753_v49 = vpop.xlane.xlu0 %1752 }
 0x9ec   :  { %v1755_v0 = vsub.f32 %v1747_v44, %v1753_v49  ;;  %v4633_v44 = vld [vmem:[%s6184_s6] ss:$0 sm:$0xff] }
 0x9ee   :  { %v1758_v50 = vmul.f32 1.442695, %v1755_v0 }
 0x9ef   :  { %v1762_v51 = vpop.xlane.xlu0 %1761 }
 0x9f0   :  { %5352 = vpow2.f32 %v1758_v50 }
 0x9f1   :  { %5354 = vrcp.f32 %v1762_v51  ;;  %v5839_v51 = vld [vmem:[%s6211_s0 + $0x8] sm:$0xff] }
 0x9f3   :  { %v1771_v52 = vpop.permute.xlu0 %1770 }
 0x9f4   :  { %4959 = vmatpush3.msra.mxu1 %v1771_v52  ;;  %v4638_v52 = vld [vmem:[%s6187_s9] ss:$0 sm:$0xff]  ;;  %s5447_s9 = smov [#allocation2]  }
 0x9f5   :  { %s4582_s0 = sshll.u32 %s5447_s9, 4  ;;  %s4583_s0 = int_to_ptr.vmem [resolvable:$true] %s4582_s0 }
 0x9f6   :  { %p5415_p1 = scmp.lt.s32.totalorder %s4583_s0, %s4583_s0 }
 0x9fa   :  { %v5353_v53 = vpop.eup %5352 }
 0x9fb   :  { %v5355_v56 = vpop.eup %5354  ;;  %v1763_v2 = vsel %vm347_vm2, %v5353_v53, 0.0 }
 0x9fc   :  { %v1767_v57 = vmul.f32 %v5355_v56, %v5351_v47  ;;  %1764 = vadd.xlane.f32.xlu1 %v1763_v2  ;;  %v2072_v47 = vld [vmem:[%s6185_s7 + $0x10] sm:$0xff] }
 0x9fd   :  { %v5194_v50 = vpack.c.bf16 %v2073_v48, %v2072_v47 }
 0x9fe   :  { %4961 = vmatmul.mubr.msk.f32.vlgmr.msra.gmra.mrb[22].mxu1 %vm347_vm2, %v1767_v57 }
 0xa0d   :  { %1846 = vrot.lane.b32.xlu1 %v5657_v54, %s5441_s26 }
 0xa11   :  { %1922 = vrot.lane.b32.xlu1 %v5575_v4, %s5440_s3  ;;  %v2009_v4 = vpop.permute.xlu0 %2008 }
 0xa89   :  { %v1765_v8 = vpop.xlane.xlu1 %1764 }
 0xa8a   :  { %5356 = vrcp.f32 %v1765_v8 }
 0xa8d   :  { %v1847_v55 = vpop.permute.xlu1 %1846 }
 0xa8e   :  { %4964 = vmatpush3.msra.mxu0 %v1847_v55 }
 0xa91   :  { %v1923_v27 = vpop.permute.xlu1 %1922 }
 0xa92   :  { %4968 = vmatprep.subr.mxu0 %v1923_v27 }
 0xa94   :  { %v5357_v58 = vpop.eup %5356 }
 0xa95   :  { %v1769_v28 = vmul.f32 %v5357_v58, %v5353_v53 }
 0xa97   :  { %4966 = vmatmul.mubr.msk.f32.vlgmr.msra.gmra.mrb[14].mxu0 %vm347_vm2, %v1769_v28 }
 0xa98   :  { %4969 = vmatpush3.msra.mxu0 %v1923_v27 }
 0xad1   :  { %v1842_v59 = vpop.f32.mrb[22].mxu1 }
 0xad2   :  { %v4962_v60 = vpop.f32.mrb[23].mxu1  ;;  %4970 = vmatprep.mubr.msk.f32.mxu0 %vm347_vm2, %v1842_v59 }
 0xb6a   :  { %v1918_v61 = vpop.f32.mrb[14].mxu0 }
 0xb6b   :  { %v4967_v54 = vpop.f32.mrb[15].mxu0  ;;  %4971 = vmatmul.mubr.msk.f32.vlgmr.msra.gmra.mrb[8].mxu0 %vm347_vm2, %v1918_v61 }
 0xb6c   :  { %5003 = vmatprep.mubr.msk.f32.mxu0 %vm81_vm0, %v5813_v32 }
 0xc3e   :  { %v4972_v62 = vpop.f32.mrb[8].mxu0 }
 0xc3f   :  { %v2012_v63 = vadd.f32 %v4972_v62, %v2009_v4  ;;  %v1997_v3 = vpop.f32.mrb[9].mxu0 }
 0xc40   :  { %v2011_v5 = vadd.f32 %v2009_v4, %v1997_v3 }
 0xc41   :  { %v2014_v7 = vadd.f32 %v2012_v63, %v5604_v10 }
 0xc42   :  { %v2013_v9 = vadd.f32 %v2011_v5, %v5582_v6  ;;  %v2074_v6 = vld [vmem:[%s6186_s8] sm:$0xff]  ;;  %s5410_s8 = scalar_lea.vmem %s4583_s0, 256 }
 0xc43   :  { %v2020_v11 = vsel %vm81_vm0, %v2014_v7, 0.0  ;;  %v5182_v26 = vpack.c.bf16 %v2075_v25, %v2074_v6  ;;  %v5442_v6 = vmov 0   ;;  %p5411_p0 = scmp.ne.s32.totalorder %s4583_s0, %s5410_s8  ;;  %p5416_p2 = scmp.lt.s32.totalorder %s5410_s8, %s5410_s8 }
 0xc44   :  { %2021 = vadd.xlane.f32.xlu0 %v2020_v11  ;;  %v2017_v13 = vsel %vm81_vm0, %v2013_v9, 0.0  ;;  %5296 = vset.pattern.permute.xlu1 %v5442_v6 }
 0xc45   :  { %2018 = vadd.xlane.f32.xlu1 %v2017_v13  ;;  %5183 = vmatprep.subr.bf16.mxu1 %v5182_v26  ;;  %p5417_p3 = por %p5416_p2, %p5415_p1 }
 0xc46   :  { %5185 = vmatpush3.bf16.msra.mxu1 %v5182_v26  ;;  %5300 = vset.pattern.permute.xlu0 %v5442_v6 }
 0xc47   :  { %5187 = vmatprep.subr.bf16.mxu1 %v5186_v29  ;;  %p5418_p4 = pnand %p5417_p3, %p5411_p0 }
 0xc4a   :  { %5189 = vmatpush3.bf16.msra.mxu1 %v5186_v29 }
 0xc4b   :  { %5191 = vmatprep.subr.bf16.mxu1 %v5190_v31 }
 0xcd1   :  { %v2022_v14 = vpop.xlane.xlu0 %2021 }
 0xcd2   :  { %v2025_v15 = vmul.f32 0.03125, %v2022_v14  ;;  %v2019_v16 = vpop.xlane.xlu1 %2018 }
 0xcd3   :  { %v2024_v17 = vmul.f32 0.03125, %v2019_v16 }
 0xcd4   :  { %v2027_v18 = vsub.f32 %v2014_v7, %v2025_v15 }
 0xcd5   :  { %v2026_v20 = vsub.f32 %v2013_v9, %v2024_v17 }
 0xcd6   :  { %v2029_v21 = vmul.f32 %v2027_v18, %v2027_v18 }
 0xcd7   :  { %v2028_v22 = vmul.f32 %v2026_v20, %v2026_v20 }
 0xcd8   :  { %v2033_v1 = vsel %vm81_vm0, %v2029_v21, 0.0 }
 0xcd9   :  { %2034 = vadd.xlane.f32.xlu1 %v2033_v1  ;;  %v2030_v10 = vsel %vm81_vm0, %v2028_v22, 0.0 }
 0xcda   :  { %2031 = vadd.xlane.f32.xlu0 %v2030_v10 }
 0xd66   :  { %v2035_v33 = vpop.xlane.xlu1 %2034 }
 0xd67   :  { %v2037_v34 = vmul.f32 0.03125, %v2035_v33  ;;  %v2032_v35 = vpop.xlane.xlu0 %2031  ;;  %v5856_v33 = vld [vmem:[%s6188_s10] sm:$0xff] }
 0xd68   :  { %v2036_v36 = vmul.f32 0.03125, %v2032_v35 }
 0xd69   :  { %v2039_v37 = vadd.f32 1e-05, %v2037_v34  ;;  %v5861_v34 = vld [vmem:[%s6188_s10 + $0x8] sm:$0xff] }
 0xd6a   :  { %v2038_v38 = vadd.f32 1e-05, %v2036_v36  ;;  %v5316_v35 = vpack.i.bf16 %v5861_v34, %v5856_v33  ;;  %v5445_v36 = vmov 2  }
 0xd6b   :  { %5358 = vrsqrt.f32 %v2039_v37  ;;  %v5446_v37 = vmov 3  }
 0xd6c   :  { %5360 = vrsqrt.f32 %v2038_v38  ;;  %v5198_v38 = vpack.c.bf16 %v5861_v34, %v5856_v33 }
 0xd6e   :  { %5199 = vmatprep.subr.bf16.mxu0 %v5198_v38 }
 0xd6f   :  { %5201 = vmatpush3.bf16.msra.mxu0 %v5198_v38 }
 0xd75   :  { %v5359_v39 = vpop.eup %5358 }
 0xd76   :  { %v5361_v41 = vpop.eup %5360  ;;  %v2043_v42 = vmul.f32 %v5359_v39, %v2027_v18  ;;  %v5871_v39 = vld [vmem:[%s6188_s10 + $0x10] sm:$0xff] }
 0xd77   :  { %v2042_v43 = vmul.f32 %v5361_v41, %v2026_v20 }
 0xd78   :  { %v2051_v45 = vmul.f32 %v4632_v40, %v2043_v42 }
 0xd79   :  { %v2050_v46 = vmul.f32 %v4632_v40, %v2042_v43  ;;  %v5876_v40 = vld [vmem:[%s6188_s10 + $0x18] sm:$0xff]  ;;  %v5890_v43 = vld [vmem:[%s6189_s11] ss:$0 sm:$0xff]  ;;  %s6212_s11 = sld [smem:[#allocation7_spill]] }
 0xd7a   :  { %v5829_v0 = vadd.f32 %v4633_v44, %v2051_v45  ;;  %v5202_v41 = vpack.c.bf16 %v5876_v40, %v5871_v39  ;;  %v5311_v42 = vpack.i.bf16 %v5876_v40, %v5871_v39 }
 0xd7b   :  { %v2058_v49 = vadd.f32 %v4633_v44, %v2050_v46 }
 0xd7c   :  { %5203 = vmatprep.subr.bf16.mxu0 %v5202_v41 }
 0xd7d   :  { %4981 = vmatprep.mubr.msk.f32.mxu1 %vm81_vm0, %v2058_v49  ;;  %5205 = vmatpush3.bf16.msra.mxu0 %v5202_v41 }
 0xd7e   :  { %4982 = vmatmul.mubr.msk.f32.vlgmr.msra.gmra.mrb[24].mxu1 %vm81_vm0, %v5829_v0 }
 0xd7f   :  { %5193 = vmatpush3.bf16.msra.mxu1 %v5190_v31  ;;  %4992 = vmatprep.mubr.msk.f32.mxu1 %vm81_vm0, %v5813_v32  ;;  %v5444_v31 = vmov 4  }
 0xd80   :  { %5195 = vmatprep.subr.bf16.mxu1 %v5194_v50  ;;  %5004 = vmatmul.mubr.msk.f32.vlgmr.msra.gmra.mrb[16].mxu0 %vm81_vm0, %v5839_v51 }
 0xd83   :  { %5197 = vmatpush3.bf16.msra.mxu1 %v5194_v50 }
 0xd86   :  { %4993 = vmatmul.mubr.msk.f32.vlgmr.msra.gmra.mrb[24].mxu1 %vm81_vm0, %v5839_v51 }
 0xd87   :  { %5025 = vmatprep.mubr.msk.f32.mxu1 %vm81_vm0, %v2058_v49 }
 0xe59   :  { %v4994_v53 = vpop.f32.mrb[24].mxu1 }
 0xe5a   :  { %v2248_v56 = vadd.f32 %v4994_v53, %v4638_v52  ;;  %v2232_v2 = vpop.f32.mrb[25].mxu1 }
 0xe5b   :  { %v2247_v57 = vadd.f32 %v4638_v52, %v2232_v2 }
 0xe5c   :  { %v2257_v8 = vsel %vm2249_vm3, %v2248_v56, 0.0 }
 0xe5d   :  { %v2258_v55 = vrot.slane %v2257_v8, 4  ;;  %v2250_v27 = vsel %vm2249_vm3, %v2247_v57, 0.0  ;;  %v2061_v57 = vld [vmem:[%s6212_s11 + $0x8] sm:$0xff] }
 0xe5e   :  { %v2251_v58 = vrot.slane %v2250_v27, 4 }
 0xe5f   :  { %v2259_v28 = vadd.f32 %v2258_v55, %v2257_v8  ;;  %v2060_v55 = vld [vmem:[%s6212_s11] sm:$0xff] }
 0xe60   :  { %v2252_v59 = vadd.f32 %v2251_v58, %v2250_v27  ;;  %v2062_v27 = vld [vmem:[%s6212_s11 + $0x10] sm:$0xff] }
 0xe61   :  { %v2260_v60 = vrot.slane %v2259_v28, 2 }
 0xe62   :  { %v2253_v61 = vrot.slane %v2252_v59, 2 }
 0xe63   :  { %v2261_v54 = vadd.f32 %v2260_v60, %v2259_v28  ;;  %v2063_v28 = vld [vmem:[%s6212_s11 + $0x18] sm:$0xff] }
 0xe64   :  { %v2254_v4 = vadd.f32 %v2253_v61, %v2252_v59 }
 0xe65   :  { %v2262_v62 = vrot.slane %v2261_v54, 1 }
 0xe66   :  { %v2255_v63 = vrot.slane %v2254_v4, 1 }
 0xe67   :  { %v2263_v3 = vadd.f32 %v2262_v62, %v2261_v54  ;;  %v2064_v62 = vld [vmem:[%s6212_s11 + $0x20] sm:$0xff] }
 0xe68   :  { %v2256_v5 = vadd.f32 %v2255_v63, %v2254_v4 }
 0xe69   :  { %v2266_v7 = vmul.f32 0.125, %v2263_v3  ;;  %v2066_v3 = vld [vmem:[%s6212_s11 + $0x30] sm:$0xff] }
 0xe6a   :  { %v2265_v9 = vmul.f32 0.125, %v2256_v5 }
 0xe6b   :  { %v2270_v11 = vsel %vm2249_vm3, %v2266_v7, -inf }
 0xe6c   :  { %2271 = vmax.xlane.f32.xlu1 %v2270_v11  ;;  %v2267_v13 = vsel %vm2249_vm3, %v2265_v9, -inf  ;;  %v2065_v11 = vld [vmem:[%s6212_s11 + $0x28] sm:$0xff] }
 0xe6d   :  { %2268 = vmax.xlane.f32.xlu0 %v2267_v13  ;;  %v2067_v13 = vld [vmem:[%s6212_s11 + $0x38] sm:$0xff] }
 0xef9   :  { %v2272_v14 = vpop.xlane.xlu1 %2271 }
 0xefa   :  { %v2274_v15 = vsub.f32 %v2266_v7, %v2272_v14  ;;  %v2269_v16 = vpop.xlane.xlu0 %2268 }
 0xefb   :  { %v2273_v17 = vsub.f32 %v2265_v9, %v2269_v16  ;;  %v2068_v16 = vld [vmem:[%s6212_s11 + $0x40] sm:$0xff] }
 0xefc   :  { %v2277_v18 = vmul.f32 1.442695, %v2274_v15 }
 0xefd   :  { %v2275_v20 = vmul.f32 1.442695, %v2273_v17 }
 0xefe   :  { %5362 = vpow2.f32 %v2277_v18 }
 0xeff   :  { %5364 = vpow2.f32 %v2275_v20 }
 0xf08   :  { %v5363_v21 = vpop.eup %5362 }
 0xf09   :  { %v5365_v22 = vpop.eup %5364  ;;  %v2282_v1 = vsel %vm2249_vm3, %v5363_v21, 0.0 }
 0xf0a   :  { %2283 = vadd.xlane.f32.xlu1 %v2282_v1  ;;  %v2279_v10 = vsel %vm2249_vm3, %v5365_v22, 0.0 }
 0xf0b   :  { %2280 = vadd.xlane.f32.xlu0 %v2279_v10 }
 0xf97   :  { %v2284_v25 = vpop.xlane.xlu1 %2283 }
 0xf98   :  { %5366 = vrcp.f32 %v2284_v25  ;;  %v2281_v26 = vpop.xlane.xlu0 %2280 }
 0xf99   :  { %5368 = vrcp.f32 %v2281_v26 }
 0xfa2   :  { %v5367_v23 = vpop.eup %5366 }
 0xfa3   :  { %v5369_v24 = vpop.eup %5368  ;;  %v2288_v29 = vmul.f32 %v5367_v23, %v5363_v21 }
 0xfa4   :  { %v2286_v30 = vmul.f32 %v5369_v24, %v5365_v22 }
 0xfa5   :  { %2296 = vperm.xlu1 %5296, %v2288_v29  }
 0xfa6   :  { %2291 = vperm.xlu0 %5300, %v2286_v30  }
 0xfa9   :  { %5297 = vset.pattern.permute.xlu1 %v5443_v12 }
 0xfaa   :  { %2308 = vperm.xlu1 %5297, %v2288_v29   ;;  %5301 = vset.pattern.permute.xlu0 %v5444_v31 }
 0xfab   :  { %2344 = vperm.xlu0 %5301, %v2288_v29  }
 0xfae   :  { %5298 = vset.pattern.permute.xlu1 %v5445_v36 }
 0xfaf   :  { %2320 = vperm.xlu1 %5298, %v2288_v29   ;;  %5317 = vrot.lane.b32.xlu0 %v5316_v35, %s5437_s24 }
 0xfb3   :  { %5299 = vset.pattern.permute.xlu1 %v5446_v37  ;;  %2453 = vrot.lane.b32.xlu0 %v5890_v43, %s5434_s1 }
 0xfb4   :  { %2332 = vperm.xlu1 %5299, %v2288_v29   ;;  %v2069_v29 = vld [vmem:[%s6212_s11 + $0x48] sm:$0xff] }
 0xfb8   :  { %5302 = vset.pattern.permute.xlu1 %v5443_v12 }
 0xfb9   :  { %2304 = vperm.xlu1 %5302, %v2286_v30  }
 0xfbd   :  { %5303 = vset.pattern.permute.xlu1 %v5445_v36 }
 0xfbe   :  { %2316 = vperm.xlu1 %5303, %v2286_v30  }
 0xfc2   :  { %5304 = vset.pattern.permute.xlu1 %v5446_v37 }
 0xfc3   :  { %2328 = vperm.xlu1 %5304, %v2286_v30  }
 0xfc7   :  { %5305 = vset.pattern.permute.xlu1 %v5444_v31 }
 0xfc8   :  { %2340 = vperm.xlu1 %5305, %v2286_v30  }
 0xfcc   :  { %5307 = vrot.lane.b32.xlu1 %v5316_v35, %s5434_s1 }
 0xfd0   :  { %5312 = vrot.lane.b32.xlu1 %v5311_v42, %s5434_s1 }
 0xfd4   :  { %5322 = vrot.lane.b32.xlu1 %v5311_v42, %s5437_s24  ;;  %v5005_v42 = vpop.f32.mrb[16].mxu0 }
0x1024   :  { %v2297_v44 = vpop.permute.xlu1 %2296 }
0x1025   :  { %v2292_v45 = vpop.permute.xlu0 %2291  ;;  %v2300_v18 = vmul.f32 %v2297_v44, %v2065_v11  ;;  %v2428_v44 = vpop.f32.mrb[17].mxu0 }
0x1026   :  { %v2299_v59 = vmul.f32 %v2292_v45, %v2060_v55 }
0x1029   :  { %v2309_v46 = vpop.permute.xlu1 %2308 }
0x102a   :  { %v2345_v47 = vpop.permute.xlu0 %2344  ;;  %v2312_v14 = vmul.f32 %v2309_v46, %v2066_v3 }
0x102b   :  { %v2348_v35 = vmul.f32 %v2345_v47, %v2069_v29 }
0x102c   :  { %v2314_v1 = vadd.f32 %v2312_v14, %v2300_v18 }
0x102e   :  { %v2321_v48 = vpop.permute.xlu1 %2320  ;;  %v5318_v49 = vpop.permute.xlu0 %5317 }
0x102f   :  { %v5320_v50 = vunpack.i.h.bf16 %v5318_v49  ;;  %v5319_v52 = vunpack.i.l.bf16 %v5318_v49  ;;  %v2324_v20 = vmul.f32 %v2321_v48, %v2067_v13 }
0x1031   :  { %v5214_v53 = vpack.c.bf16 %v5320_v50, %v5319_v52  ;;  %v2326_v26 = vadd.f32 %v2324_v20, %v2314_v1  ;;  %v5941_v50 = vadd.f32 %v5005_v42, %v5890_v43 }
0x1032   :  { %v2454_v45 = vpop.permute.xlu0 %2453 }
0x1033   :  { %v2333_v56 = vpop.permute.xlu1 %2332  ;;  %5215 = vmatprep.subr.bf16.mxu1 %v5214_v53 }
0x1034   :  { %5217 = vmatpush3.bf16.msra.mxu1 %v5214_v53  ;;  %v2336_v10 = vmul.f32 %v2333_v56, %v2068_v16 }
0x1036   :  { %v2338_v30 = vadd.f32 %v2336_v10, %v2326_v26 }
0x1038   :  { %v2305_v2 = vpop.permute.xlu1 %2304  ;;  %v2350_v38 = vadd.f32 %v2348_v35, %v2338_v30 }
0x1039   :  { %v2311_v58 = vmul.f32 %v2305_v2, %v2061_v57 }
0x103b   :  { %v2313_v54 = vadd.f32 %v2311_v58, %v2299_v59 }
0x103d   :  { %v2317_v8 = vpop.permute.xlu1 %2316 }
0x103e   :  { %v2323_v60 = vmul.f32 %v2317_v8, %v2062_v27 }
0x1040   :  { %v2325_v63 = vadd.f32 %v2323_v60, %v2313_v54 }
0x1042   :  { %v2329_v61 = vpop.permute.xlu1 %2328 }
0x1043   :  { %v2335_v4 = vmul.f32 %v2329_v61, %v2063_v28 }
0x1045   :  { %v2337_v7 = vadd.f32 %v2335_v4, %v2325_v63 }
0x1047   :  { %v2341_v5 = vpop.permute.xlu1 %2340 }
0x1048   :  { %v2347_v9 = vmul.f32 %v2341_v5, %v2064_v62 }
0x104a   :  { %v2349_v15 = vadd.f32 %v2347_v9, %v2337_v7 }
0x104b   :  { %v5308_v17 = vpop.permute.xlu1 %5307 }
0x104c   :  { %v5310_v21 = vunpack.i.h.bf16 %v5308_v17  ;;  %v5309_v22 = vunpack.i.l.bf16 %v5308_v17  ;;  %5014 = vmatprep.mubr.msk.f32.mxu0 %vm81_vm0, %v2349_v15 }
0x104e   :  { %v5206_v6 = vpack.c.bf16 %v5310_v21, %v5309_v22 }
0x104f   :  { %v5313_v25 = vpop.permute.xlu1 %5312 }
0x1050   :  { %v5315_v23 = vunpack.i.h.bf16 %v5313_v25  ;;  %v5314_v24 = vunpack.i.l.bf16 %v5313_v25  ;;  %5207 = vmatprep.subr.bf16.mxu0 %v5206_v6 }
0x1051   :  { %5209 = vmatpush3.bf16.msra.mxu0 %v5206_v6 }
0x1052   :  { %v5210_v12 = vpack.c.bf16 %v5315_v23, %v5314_v24 }
0x1053   :  { %v5323_v31 = vpop.permute.xlu1 %5322 }
0x1054   :  { %v5325_v36 = vunpack.i.h.bf16 %v5323_v31  ;;  %v5324_v37 = vunpack.i.l.bf16 %v5323_v31  ;;  %5211 = vmatprep.subr.bf16.mxu0 %v5210_v12 }
0x1055   :  { %5213 = vmatpush3.bf16.msra.mxu0 %v5210_v12 }
0x1056   :  { %v5218_v41 = vpack.c.bf16 %v5325_v36, %v5324_v37  ;;  %5028 = vmatprep.subr.mxu0 %v5435_v19 }
0x1058   :  { %5015 = vmatmul.mubr.msk.f32.vlgmr.msra.gmra.mrb[18].mxu0 %vm81_vm0, %v2350_v38  ;;  %5219 = vmatprep.subr.bf16.mxu1 %v5218_v41 }
0x1059   :  { %5221 = vmatpush3.bf16.msra.mxu1 %v5218_v41  ;;  %5030 = vmatprep.mubr.msk.f32.mxu0 %vm5436_vm1, %v5435_v19 }
0x105a   :  { %5033 = vmatprep.subr.mxu1 %v5435_v19 }
0x105c   :  { %5026 = vmatmul.mubr.msk.f32.vlgmr.msra.gmra.mrb[26].mxu1 %vm81_vm0, %v5829_v0  ;;  %v5947_v0 = vadd.f32 %v5890_v43, %v2428_v44 }
0x105d   :  { %5035 = vmatprep.mubr.msk.f32.mxu1 %vm5436_vm1, %v5435_v19 }
0x112b   :  { %v5016_v46 = vpop.f32.mrb[18].mxu0 }
0x112c   :  { %v5934_v47 = vadd.f32 %v5016_v46, %v2454_v45  ;;  %v2528_v48 = vpop.f32.mrb[19].mxu0 }
0x112d   :  { %v5936_v49 = vadd.f32 %v2528_v48, %v2454_v45 }
0x112e   :  { %5034 = vmatpush3.xpose.msk.msra.mxu1 %vm347_vm2, %v5934_v47 }
0x112f   :  { %v5027_v52 = vpop.f32.mrb[26].mxu1  ;;  %5029 = vmatpush3.xpose.msk.msra.mxu0 %vm347_vm2, %v5936_v49  ;;  %5043 = vmatprep.subr.mxu1 %v5435_v19 }
0x1130   :  { %v2618_v53 = vpop.f32.mrb[27].mxu1  ;;  %5038 = vmatprep.subr.mxu0 %v5435_v19 }
0x1131   :  { %5036 = vmatmul.mubr.msk.f32.vlgmr.msra.gmra.mrb[28].mxu1 %vm347_vm2, %v5941_v50 }
0x1132   :  { %5031 = vmatmul.mubr.msk.f32.vlgmr.msra.gmra.mrb[20].mxu0 %vm347_vm2, %v5947_v0  ;;  %5045 = vmatprep.mubr.msk.f32.mxu1 %vm5436_vm1, %v5435_v19 }
0x1133   :  { %5040 = vmatprep.mubr.msk.f32.mxu0 %vm5436_vm1, %v5435_v19 }
0x1204   :  { %v2775_v56 = vpop.f32.mrb[28].mxu1 }
0x1205   :  { %v2780_v2 = vmul.f32 0.35355338, %v2775_v56  ;;  %v2699_v57 = vpop.f32.mrb[20].mxu0  ;;  %v5037_v8 = vpop.f32.mrb[29].mxu1 }
0x1206   :  { %v5032_v55 = vpop.f32.mrb[21].mxu0  ;;  %v2779_v54 = vmul.f32 0.35355338, %v2699_v57 }
0x1207   :  { %v2784_v27 = vsel %vm347_vm2, %v2780_v2, -inf }
0x1208   :  { %2785 = vmax.xlane.f32.xlu1 %v2784_v27  ;;  %v2781_v4 = vsel %vm347_vm2, %v2779_v54, -inf }
0x1219   :  { %3029 = vrot.lane.b32.xlu1 %v5934_v47, %s5438_s2 }
0x121d   :  { %3027 = vrot.lane.b32.xlu1 %v5941_v50, %s5438_s2 }
0x1295   :  { %v2786_v58 = vpop.xlane.xlu1 %2785 }
0x1296   :  { %v2788_v28 = vsub.f32 %v2780_v2, %v2786_v58 }
0x1298   :  { %v2791_v59 = vmul.f32 1.442695, %v2788_v28 }
0x1299   :  { %v3030_v9 = vpop.permute.xlu1 %3029 }
0x129a   :  { %5370 = vpow2.f32 %v2791_v59 }
0x129d   :  { %v3028_v13 = vpop.permute.xlu1 %3027 }
0x12a4   :  { %v5371_v60 = vpop.eup %5370 }
0x12a5   :  { %v2796_v61 = vsel %vm347_vm2, %v5371_v60, 0.0 }
0x12a6   :  { %2797 = vadd.xlane.f32.xlu0 %v2796_v61 }
0x12bc   :  { %2549 = vrot.lane.b32.xlu0 %v5890_v43, %s5437_s24 }
0x12db   :  { %2782 = vmax.xlane.f32.xlu0 %v2781_v4 }
0x12f1   :  { %2951 = vrot.lane.b32.xlu0 %v5936_v49, %s5438_s2 }
0x1333   :  { %v2798_v62 = vpop.xlane.xlu0 %2797 }
0x1334   :  { %5372 = vrcp.f32 %v2798_v62 }
0x1337   :  { %v2550_v63 = vpop.permute.xlu0 %2549 }
0x1338   :  { %v5969_v3 = vadd.f32 %v2618_v53, %v2550_v63  ;;  %v5971_v5 = vadd.f32 %v5027_v52, %v2550_v63 }
0x133a   :  { %5039 = vmatpush3.msra.mxu0 %v5969_v3  ;;  %5044 = vmatpush3.msra.mxu1 %v5971_v5 }
0x133b   :  { %5053 = vmatprep.subr.mxu1 %v5435_v19  ;;  %5048 = vmatprep.subr.mxu0 %v5435_v19 }
0x133e   :  { %v5373_v7 = vpop.eup %5372 }
0x133f   :  { %v2802_v11 = vmul.f32 %v5373_v7, %v5371_v60 }
0x1341   :  { %5046 = vmatmul.mubr.msk.f32.vlgmr.msra.gmra.mrb[30].mxu1 %vm347_vm2, %v2802_v11 }
0x1342   :  { %5054 = vmatpush3.xpose.msk.msra.mxu1 %vm347_vm2, %v3030_v9  ;;  %5055 = vmatprep.mubr.msk.f32.mxu1 %vm5436_vm1, %v5435_v19 }
0x1343   :  { %5063 = vmatprep.subr.mxu1 %v5435_v19 }
0x1345   :  { %5056 = vmatmul.mubr.msk.f32.vlgmr.msra.gmra.mrb[32].mxu1 %vm347_vm2, %v3028_v13 }
0x1346   :  { %5065 = vmatprep.mubr.msk.f32.mxu1 %vm5436_vm1, %v5435_v19 }
0x1368   :  { %v2783_v14 = vpop.xlane.xlu0 %2782 }
0x1369   :  { %v2787_v15 = vsub.f32 %v2779_v54, %v2783_v14 }
0x136b   :  { %v2789_v16 = vmul.f32 1.442695, %v2787_v15 }
0x136c   :  { %v2952_v1 = vpop.permute.xlu0 %2951 }
0x136d   :  { %5374 = vpow2.f32 %v2789_v16 }
0x1377   :  { %v5375_v17 = vpop.eup %5374 }
0x1378   :  { %v2793_v18 = vsel %vm347_vm2, %v5375_v17, 0.0 }
0x1379   :  { %2794 = vadd.xlane.f32.xlu1 %v2793_v18 }
0x138a   :  { %2949 = vrot.lane.b32.xlu1 %v5947_v0, %s5438_s2 }
0x138e   :  { %3453 = vrot.lane.b32.xlu1 %v5936_v49, %s5439_s25 }
0x1406   :  { %v2795_v20 = vpop.xlane.xlu1 %2794 }
0x1407   :  { %5376 = vrcp.f32 %v2795_v20 }
0x140a   :  { %v2950_v25 = vpop.permute.xlu1 %2949 }
0x140e   :  { %v3454_v48 = vpop.permute.xlu1 %3453 }
0x1411   :  { %v5377_v21 = vpop.eup %5376 }
0x1412   :  { %v2800_v22 = vmul.f32 %v5377_v21, %v5375_v17 }
0x1414   :  { %5041 = vmatmul.mubr.msk.f32.vlgmr.msra.gmra.mrb[22].mxu0 %vm347_vm2, %v2800_v22  ;;  %v5991_v10 = vpop.f32.mrb[30].mxu1 }
0x1415   :  { %5049 = vmatpush3.xpose.msk.msra.mxu0 %vm347_vm2, %v2952_v1  ;;  %v5047_v6 = vpop.f32.mrb[31].mxu1  ;;  %5050 = vmatprep.mubr.msk.f32.mxu0 %vm5436_vm1, %v5435_v19 }
0x1416   :  { %5058 = vmatprep.subr.mxu0 %v5435_v19 }
0x1418   :  { %5051 = vmatmul.mubr.msk.f32.vlgmr.msra.gmra.mrb[24].mxu0 %vm347_vm2, %v2950_v25  ;;  %v3101_v26 = vpop.f32.mrb[32].mxu1 }
0x1419   :  { %v3106_v23 = vmul.f32 0.35355338, %v3101_v26  ;;  %v5057_v24 = vpop.f32.mrb[33].mxu1  ;;  %5060 = vmatprep.mubr.msk.f32.mxu0 %vm5436_vm1, %v5435_v19 }
0x141b   :  { %v3110_v29 = vsel %vm347_vm2, %v3106_v23, -inf }
0x141c   :  { %3111 = vmax.xlane.f32.xlu0 %v3110_v29 }
0x1432   :  { %3207 = vrot.lane.b32.xlu0 %v5971_v5, %s5438_s2 }
0x1436   :  { %3451 = vrot.lane.b32.xlu0 %v5947_v0, %s5439_s25 }
0x143a   :  { %3529 = vrot.lane.b32.xlu0 %v5941_v50, %s5439_s25 }
0x14a9   :  { %v3112_v30 = vpop.xlane.xlu0 %3111 }
0x14aa   :  { %v3114_v12 = vsub.f32 %v3106_v23, %v3112_v30 }
0x14ac   :  { %v3117_v31 = vmul.f32 1.442695, %v3114_v12 }
0x14ad   :  { %v3208_v35 = vpop.permute.xlu0 %3207 }
0x14ae   :  { %5378 = vpow2.f32 %v3117_v31  ;;  %5064 = vmatpush3.msra.mxu1 %v3208_v35 }
0x14af   :  { %5078 = vmatprep.subr.mxu1 %v5435_v19 }
0x14b1   :  { %v3452_v2 = vpop.permute.xlu0 %3451 }
0x14b5   :  { %v3530_v8 = vpop.permute.xlu0 %3529 }
0x14b8   :  { %v5379_v36 = vpop.eup %5378 }
0x14b9   :  { %v3122_v37 = vsel %vm347_vm2, %v5379_v36, 0.0 }
0x14ba   :  { %3123 = vadd.xlane.f32.xlu1 %v3122_v37 }
0x14cb   :  { %3531 = vrot.lane.b32.xlu1 %v5934_v47, %s5439_s25 }
0x14e7   :  { %v6011_v38 = vpop.f32.mrb[22].mxu0 }
0x14e8   :  { %v5042_v41 = vpop.f32.mrb[23].mxu0 }
0x14eb   :  { %v3023_v42 = vpop.f32.mrb[24].mxu0 }
0x14ec   :  { %v3105_v44 = vmul.f32 0.35355338, %v3023_v42  ;;  %v5052_v45 = vpop.f32.mrb[25].mxu0 }
0x14ee   :  { %v3107_v46 = vsel %vm347_vm2, %v3105_v44, -inf }
0x14ef   :  { %3108 = vmax.xlane.f32.xlu1 %v3107_v46 }
0x1547   :  { %v3124_v52 = vpop.xlane.xlu1 %3123 }
0x1548   :  { %5380 = vrcp.f32 %v3124_v52 }
0x154b   :  { %v3532_v57 = vpop.permute.xlu1 %3531 }
0x1552   :  { %v5381_v53 = vpop.eup %5380 }
0x1553   :  { %v3128_v56 = vmul.f32 %v5381_v53, %v5379_v36 }
0x1555   :  { %5066 = vmatmul.mubr.msk.f32.vlgmr.msra.gmra.mrb[34].mxu1 %vm347_vm2, %v3128_v56 }
0x1556   :  { %5079 = vmatpush3.xpose.msk.msra.mxu1 %vm347_vm2, %v3454_v48  ;;  %5080 = vmatprep.mubr.msk.f32.mxu1 %vm5436_vm1, %v5435_v19 }
0x1557   :  { %5083 = vmatprep.subr.mxu1 %v5435_v19 }
0x1559   :  { %5081 = vmatmul.mubr.msk.f32.vlgmr.msra.gmra.mrb[36].mxu1 %vm347_vm2, %v3452_v2 }
0x155a   :  { %5084 = vmatpush3.xpose.msk.msra.mxu1 %vm347_vm2, %v3532_v57  ;;  %5085 = vmatprep.mubr.msk.f32.mxu1 %vm5436_vm1, %v5435_v19 }
0x155b   :  { %5093 = vmatprep.subr.mxu1 %v5435_v19 }
0x155d   :  { %5086 = vmatmul.mubr.msk.f32.vlgmr.msra.gmra.mrb[38].mxu1 %vm347_vm2, %v3530_v8 }
0x155e   :  { %5095 = vmatprep.mubr.msk.f32.mxu1 %vm5436_vm1, %v5435_v19 }
0x157c   :  { %v3109_v55 = vpop.xlane.xlu1 %3108 }
0x157d   :  { %v3113_v27 = vsub.f32 %v3105_v44, %v3109_v55 }
0x157f   :  { %v3115_v58 = vmul.f32 1.442695, %v3113_v27 }
0x1581   :  { %5382 = vpow2.f32 %v3115_v58 }
0x158b   :  { %v5383_v28 = vpop.eup %5382 }
0x158c   :  { %v3119_v59 = vsel %vm347_vm2, %v5383_v28, 0.0 }
0x158d   :  { %3120 = vadd.xlane.f32.xlu0 %v3119_v59 }
0x15a3   :  { %3130 = vrot.lane.b32.xlu0 %v5969_v3, %s5438_s2 }
0x15a7   :  { %3367 = vrot.lane.b32.xlu0 %v5856_v33, %s5440_s3 }
0x15ab   :  { %3631 = vrot.lane.b32.xlu0 %v5969_v3, %s5439_s25 }
0x15af   :  { %3707 = vrot.lane.b32.xlu0 %v5971_v5, %s5439_s25 }
0x15b3   :  { %3783 = vrot.lane.b32.xlu0 %v5871_v39, %s5440_s3 }
0x15b7   :  { %3949 = vrot.lane.b32.xlu0 %v5934_v47, %s5441_s26 }
0x15bb   :  { %3947 = vrot.lane.b32.xlu0 %v5941_v50, %s5441_s26 }
0x161a   :  { %v3121_v60 = vpop.xlane.xlu0 %3120 }
0x161b   :  { %5384 = vrcp.f32 %v3121_v60 }
0x161e   :  { %v3131_v61 = vpop.permute.xlu0 %3130 }
0x161f   :  { %5059 = vmatpush3.msra.mxu0 %v3131_v61 }
0x1622   :  { %v3368_v33 = vpop.permute.xlu0 %3367 }
0x1625   :  { %v5385_v54 = vpop.eup %5384 }
0x1626   :  { %v3126_v4 = vmul.f32 %v5385_v54, %v5383_v28  ;;  %v3632_v62 = vpop.permute.xlu0 %3631 }
0x1628   :  { %5061 = vmatmul.mubr.msk.f32.vlgmr.msra.gmra.mrb[26].mxu0 %vm347_vm2, %v3126_v4  ;;  %v3279_v63 = vpop.f32.mrb[34].mxu1 }
0x1629   :  { %v5067_v7 = vpop.f32.mrb[35].mxu1 }
0x162a   :  { %v3708_v9 = vpop.permute.xlu0 %3707 }
0x162b   :  { %5094 = vmatpush3.msra.mxu1 %v3708_v9 }
0x162c   :  { %v3525_v39 = vpop.f32.mrb[36].mxu1  ;;  %5103 = vmatprep.subr.mxu1 %v5435_v19 }
0x162d   :  { %v3607_v47 = vmul.f32 0.35355338, %v3525_v39  ;;  %v5082_v11 = vpop.f32.mrb[37].mxu1 }
0x162e   :  { %v3784_v36 = vpop.permute.xlu0 %3783 }
0x162f   :  { %v3609_v50 = vsel %vm347_vm2, %v3607_v47, -inf }
0x1630   :  { %3610 = vmax.xlane.f32.xlu1 %v3609_v50  ;;  %v3603_v13 = vpop.f32.mrb[38].mxu1 }
0x1631   :  { %v3608_v14 = vmul.f32 0.35355338, %v3603_v13  ;;  %v5087_v15 = vpop.f32.mrb[39].mxu1 }
0x1632   :  { %v3950_v42 = vpop.permute.xlu0 %3949 }
0x1633   :  { %v3612_v16 = vsel %vm347_vm2, %v3608_v14, -inf }
0x1634   :  { %3613 = vmax.xlane.f32.xlu1 %v3612_v16 }
0x1636   :  { %v3948_v56 = vpop.permute.xlu0 %3947 }
0x16bd   :  { %v3611_v17 = vpop.xlane.xlu1 %3610 }
0x16be   :  { %v3615_v18 = vsub.f32 %v3607_v47, %v3611_v17 }
0x16c0   :  { %v3617_v20 = vmul.f32 1.442695, %v3615_v18 }
0x16c1   :  { %v3614_v21 = vpop.xlane.xlu1 %3613 }
0x16c2   :  { %5386 = vpow2.f32 %v3617_v20  ;;  %v3616_v22 = vsub.f32 %v3608_v14, %v3614_v21 }
0x16c4   :  { %v3619_v1 = vmul.f32 1.442695, %v3616_v22 }
0x16c6   :  { %5388 = vpow2.f32 %v3619_v1 }
0x16cc   :  { %v5387_v6 = vpop.eup %5386 }
0x16cd   :  { %v3621_v25 = vsel %vm347_vm2, %v5387_v6, 0.0 }
0x16ce   :  { %3622 = vadd.xlane.f32.xlu1 %v3621_v25 }
0x16d0   :  { %v5389_v26 = vpop.eup %5388 }
0x16d1   :  { %v3624_v23 = vsel %vm347_vm2, %v5389_v26, 0.0 }
0x16d2   :  { %3625 = vadd.xlane.f32.xlu1 %v3624_v23 }
0x16e3   :  { %3283 = vrot.lane.b32.xlu1 %v5861_v34, %s5440_s3 }
0x16e7   :  { %3871 = vrot.lane.b32.xlu1 %v5936_v49, %s5441_s26 }
0x16eb   :  { %3869 = vrot.lane.b32.xlu1 %v5947_v0, %s5441_s26 }
0x16fb   :  { %v3202_v24 = vpop.f32.mrb[26].mxu0 }
0x16fc   :  { %v5062_v29 = vpop.f32.mrb[27].mxu0  ;;  %5070 = vmatprep.mubr.msk.f32.mxu0 %vm347_vm2, %v3202_v24 }
0x175b   :  { %v3623_v30 = vpop.xlane.xlu1 %3622 }
0x175f   :  { %v3626_v12 = vpop.xlane.xlu1 %3625 }
0x1760   :  { %5390 = vrcp.f32 %v3626_v12 }
0x1761   :  { %5392 = vrcp.f32 %v3623_v30 }
0x1763   :  { %v3284_v31 = vpop.permute.xlu1 %3283 }
0x1764   :  { %5068 = vmatprep.subr.mxu0 %v3284_v31 }
0x1765   :  { %5069 = vmatpush3.msra.mxu0 %v3284_v31 }
0x1766   :  { %5071 = vmatmul.mubr.msk.f32.vlgmr.msra.gmra.mrb[28].mxu0 %vm347_vm2, %v3279_v63  ;;  %5073 = vmatprep.subr.mxu0 %v3368_v33 }
0x1767   :  { %5075 = vmatprep.mubr.msk.f32.mxu0 %vm347_vm2, %v6011_v38  ;;  %5074 = vmatpush3.msra.mxu0 %v3368_v33  ;;  %v3872_v49 = vpop.permute.xlu1 %3871 }
0x1768   :  { %5088 = vmatprep.subr.mxu0 %v5435_v19 }
0x176a   :  { %v5391_v34 = vpop.eup %5390 }
0x176b   :  { %v3630_v0 = vmul.f32 %v5391_v34, %v5389_v26  ;;  %v5393_v35 = vpop.eup %5392  ;;  %v3870_v38 = vpop.permute.xlu1 %3869  ;;  %v4339_v34 = vld [vmem:[%s6192_s14 + $0x8] sm:$0xff] }
0x176c   :  { %v3628_v37 = vmul.f32 %v5393_v35, %v5387_v6  ;;  %v4341_v35 = vld [vmem:[%s6192_s14 + $0x18] sm:$0xff] }
0x176d   :  { %5096 = vmatmul.mubr.msk.f32.vlgmr.msra.gmra.mrb[40].mxu1 %vm347_vm2, %v3630_v0  ;;  %v4340_v0 = vld [vmem:[%s6192_s14 + $0x10] sm:$0xff] }
0x176e   :  { %5104 = vmatpush3.xpose.msk.msra.mxu1 %vm347_vm2, %v3872_v49  ;;  %5076 = vmatmul.mubr.msk.f32.vlgmr.msra.gmra.mrb[28].mxu0 %vm347_vm2, %v5991_v10 }
0x176f   :  { %5089 = vmatpush3.msra.mxu0 %v3632_v62  ;;  %5105 = vmatprep.mubr.msk.f32.mxu1 %vm5436_vm1, %v5435_v19 }
0x1770   :  { %5090 = vmatprep.mubr.msk.f32.mxu0 %vm5436_vm1, %v5435_v19  ;;  %5098 = vmatprep.subr.mxu0 %v3784_v36 }
0x1771   :  { %5106 = vmatmul.mubr.msk.f32.vlgmr.msra.gmra.mrb[42].mxu1 %vm347_vm2, %v3870_v38  ;;  %5113 = vmatprep.subr.mxu1 %v5435_v19  ;;  %v4433_v38 = vld [vmem:[%s6194_s16 + $0x8] sm:$0xff] }
0x1772   :  { %5091 = vmatmul.mubr.msk.f32.vlgmr.msra.gmra.mrb[30].mxu0 %vm347_vm2, %v3628_v37  ;;  %5115 = vmatprep.mubr.msk.f32.mxu1 %vm5436_vm1, %v5435_v19  ;;  %v4432_v37 = vld [vmem:[%s6194_s16] sm:$0xff] }
0x1773   :  { %5099 = vmatpush3.msra.mxu0 %v3784_v36  ;;  %v5226_v36 = vpack.c.bf16 %v4341_v35, %v4340_v0  ;;  %v4686_v0 = vld [vmem:[%s6196_s18] ss:$0 sm:$0xff] }
0x1774   :  { %5108 = vmatprep.subr.mxu0 %v5435_v19 }
0x1840   :  { %v3779_v10 = vpop.f32.mrb[40].mxu1 }
0x1841   :  { %v5097_v41 = vpop.f32.mrb[41].mxu1 }
0x1842   :  { %v5230_v41 = vpack.c.bf16 %v4433_v38, %v4432_v37  ;;  %v4687_v38 = vld [vmem:[%s6197_s19] ss:$0 sm:$0xff] }
0x1844   :  { %v3943_v44 = vpop.f32.mrb[42].mxu1 }
0x1845   :  { %v4025_v45 = vmul.f32 0.35355338, %v3943_v44  ;;  %v3703_v46 = vpop.f32.mrb[30].mxu0  ;;  %v5107_v48 = vpop.f32.mrb[43].mxu1 }
0x1846   :  { %v5092_v52 = vpop.f32.mrb[31].mxu0  ;;  %5100 = vmatprep.mubr.msk.f32.mxu0 %vm347_vm2, %v3703_v46  ;;  %v4437_v46 = vld [vmem:[%s6194_s16 + $0x28] sm:$0xff] }
0x1847   :  { %5101 = vmatmul.mubr.msk.f32.vlgmr.msra.gmra.mrb[28].mxu0 %vm347_vm2, %v3779_v10  ;;  %v4027_v53 = vsel %vm347_vm2, %v4025_v45, -inf  ;;  %v4434_v10 = vld [vmem:[%s6194_s16 + $0x10] sm:$0xff] }
0x1848   :  { %5109 = vmatpush3.xpose.msk.msra.mxu0 %vm347_vm2, %v3950_v42  ;;  %4028 = vmax.xlane.f32.xlu1 %v4027_v53  ;;  %v4435_v42 = vld [vmem:[%s6194_s16 + $0x18] sm:$0xff] }
0x1849   :  { %5110 = vmatprep.mubr.msk.f32.mxu0 %vm5436_vm1, %v5435_v19  ;;  %5118 = vmatprep.subr.mxu0 %v5435_v19  ;;  %v5234_v44 = vpack.c.bf16 %v4435_v42, %v4434_v10 }
0x184b   :  { %5111 = vmatmul.mubr.msk.f32.vlgmr.msra.gmra.mrb[32].mxu0 %vm347_vm2, %v3948_v56 }
0x184c   :  { %5120 = vmatprep.mubr.msk.f32.mxu0 %vm5436_vm1, %v5435_v19 }
0x18d5   :  { %v4029_v2 = vpop.xlane.xlu1 %4028 }
0x18d6   :  { %v4033_v57 = vsub.f32 %v4025_v45, %v4029_v2  ;;  %v4436_v45 = vld [vmem:[%s6194_s16 + $0x20] sm:$0xff] }
0x18d7   :  { %v5238_v48 = vpack.c.bf16 %v4437_v46, %v4436_v45 }
0x18d8   :  { %v4035_v8 = vmul.f32 1.442695, %v4033_v57 }
0x18da   :  { %5394 = vpow2.f32 %v4035_v8 }
0x18e4   :  { %v5395_v59 = vpop.eup %5394 }
0x18e5   :  { %v4039_v60 = vsel %vm347_vm2, %v5395_v59, 0.0 }
0x191e   :  { %v4021_v55 = vpop.f32.mrb[32].mxu0 }
0x191f   :  { %v4026_v27 = vmul.f32 0.35355338, %v4021_v55  ;;  %v5112_v58 = vpop.f32.mrb[33].mxu0 }
0x1921   :  { %v4030_v28 = vsel %vm347_vm2, %v4026_v27, -inf }
0x1922   :  { %4031 = vmax.xlane.f32.xlu0 %v4030_v28 }
0x1926   :  { %4040 = vadd.xlane.f32.xlu0 %v4039_v60  ;;  %v4679_v60 = vld [vmem:[%s6191_s13] ss:$0 sm:$0xff] }
0x193c   :  { %4049 = vrot.lane.b32.xlu0 %v5969_v3, %s5441_s26 }
0x1940   :  { %4287 = vrot.lane.b32.xlu0 %v5890_v43, %s5440_s3 }
0x19af   :  { %v4032_v19 = vpop.xlane.xlu0 %4031 }
0x19b0   :  { %v4034_v61 = vsub.f32 %v4026_v27, %v4032_v19  ;;  %v4678_v27 = vld [vmem:[%s6190_s12] ss:$0 sm:$0xff] }
0x19b2   :  { %v4037_v33 = vmul.f32 1.442695, %v4034_v61 }
0x19b3   :  { %v4041_v54 = vpop.xlane.xlu0 %4040 }
0x19b4   :  { %5396 = vpow2.f32 %v4037_v33 }
0x19b5   :  { %5398 = vrcp.f32 %v4041_v54 }
0x19b7   :  { %v4050_v4 = vpop.permute.xlu0 %4049 }
0x19b8   :  { %5114 = vmatpush3.msra.mxu1 %v4050_v4  ;;  %v4438_v4 = vld [vmem:[%s6194_s16 + $0x30] sm:$0xff] }
0x19be   :  { %v5397_v62 = vpop.eup %5396 }
0x19bf   :  { %v5399_v63 = vpop.eup %5398  ;;  %v4042_v7 = vsel %vm347_vm2, %v5397_v62, 0.0 }
0x19c0   :  { %v4046_v9 = vmul.f32 %v5399_v63, %v5395_v59  ;;  %4043 = vadd.xlane.f32.xlu1 %v4042_v7  ;;  %v4680_v7 = vld [vmem:[%s6193_s15] ss:$0 sm:$0xff] }
0x19c2   :  { %5116 = vmatmul.mubr.msk.f32.vlgmr.msra.gmra.mrb[44].mxu1 %vm347_vm2, %v4046_v9 }
0x19d1   :  { %4125 = vrot.lane.b32.xlu1 %v5971_v5, %s5441_s26 }
0x19d5   :  { %4201 = vrot.lane.b32.xlu1 %v5876_v40, %s5440_s3  ;;  %v4288_v40 = vpop.permute.xlu0 %4287 }
0x1a4d   :  { %v4044_v43 = vpop.xlane.xlu1 %4043 }
0x1a4e   :  { %5400 = vrcp.f32 %v4044_v43 }
0x1a51   :  { %v4126_v3 = vpop.permute.xlu1 %4125 }
0x1a52   :  { %5119 = vmatpush3.msra.mxu0 %v4126_v3 }
0x1a55   :  { %v4202_v39 = vpop.permute.xlu1 %4201 }
0x1a56   :  { %5123 = vmatprep.subr.mxu0 %v4202_v39 }
0x1a58   :  { %v5401_v47 = vpop.eup %5400 }
0x1a59   :  { %v4048_v11 = vmul.f32 %v5401_v47, %v5397_v62  ;;  %v4439_v62 = vld [vmem:[%s6194_s16 + $0x38] sm:$0xff] }
0x1a5a   :  { %v5242_v63 = vpack.c.bf16 %v4439_v62, %v4438_v4 }
0x1a5b   :  { %5121 = vmatmul.mubr.msk.f32.vlgmr.msra.gmra.mrb[34].mxu0 %vm347_vm2, %v4048_v11 }
0x1a5c   :  { %5124 = vmatpush3.msra.mxu0 %v4202_v39 }
0x1a5d   :  { %5231 = vmatprep.subr.bf16.mxu0 %v5230_v41 }
0x1a95   :  { %v4121_v50 = vpop.f32.mrb[44].mxu1 }
0x1a96   :  { %v5117_v13 = vpop.f32.mrb[45].mxu1  ;;  %5125 = vmatprep.mubr.msk.f32.mxu0 %vm347_vm2, %v4121_v50  ;;  %v4683_v50 = vld [vmem:[%s6195_s17] ss:$0 sm:$0xff] }
0x1b2e   :  { %v4197_v14 = vpop.f32.mrb[34].mxu0 }
0x1b2f   :  { %v5122_v5 = vpop.f32.mrb[35].mxu0  ;;  %5126 = vmatmul.mubr.msk.f32.vlgmr.msra.gmra.mrb[28].mxu0 %vm347_vm2, %v4197_v14 }
0x1b30   :  { %5233 = vmatpush3.bf16.msra.mxu0 %v5230_v41 }
0x1b31   :  { %5235 = vmatprep.subr.bf16.mxu0 %v5234_v44 }
0x1b34   :  { %5237 = vmatpush3.bf16.msra.mxu0 %v5234_v44 }
0x1b35   :  { %5239 = vmatprep.subr.bf16.mxu0 %v5238_v48 }
0x1b38   :  { %5241 = vmatpush3.bf16.msra.mxu0 %v5238_v48 }
0x1b39   :  { %5243 = vmatprep.subr.bf16.mxu0 %v5242_v63 }
0x1b3c   :  { %5245 = vmatpush3.bf16.msra.mxu0 %v5242_v63 }
0x1c02   :  { %v5127_v15 = vpop.f32.mrb[28].mxu0 }
0x1c03   :  { %v4291_v16 = vadd.f32 %v5127_v15, %v4288_v40  ;;  %v4276_v17 = vpop.f32.mrb[29].mxu0 }
0x1c04   :  { %v4290_v18 = vadd.f32 %v4288_v40, %v4276_v17 }
0x1c05   :  { %v4293_v20 = vadd.f32 %v4291_v16, %v5839_v51 }
0x1c06   :  { %v4292_v21 = vadd.f32 %v4290_v18, %v5813_v32  ;;  %v4338_v32 = vld [vmem:[%s6192_s14] sm:$0xff] }
0x1c07   :  { %v4299_v22 = vsel %vm81_vm0, %v4293_v20, 0.0  ;;  %v5222_v49 = vpack.c.bf16 %v4339_v34, %v4338_v32 }
0x1c08   :  { %4300 = vadd.xlane.f32.xlu0 %v4299_v22  ;;  %v4296_v1 = vsel %vm81_vm0, %v4292_v21, 0.0 }
0x1c09   :  { %4297 = vadd.xlane.f32.xlu1 %v4296_v1  ;;  %5223 = vmatprep.subr.bf16.mxu1 %v5222_v49 }
0x1c0a   :  { %5225 = vmatpush3.bf16.msra.mxu1 %v5222_v49 }
0x1c0b   :  { %5227 = vmatprep.subr.bf16.mxu1 %v5226_v36 }
0x1c0e   :  { %5229 = vmatpush3.bf16.msra.mxu1 %v5226_v36 }
0x1c95   :  { %v4301_v6 = vpop.xlane.xlu0 %4300 }
0x1c96   :  { %v4303_v25 = vmul.f32 0.03125, %v4301_v6  ;;  %v4298_v26 = vpop.xlane.xlu1 %4297 }
0x1c97   :  { %v4302_v23 = vmul.f32 0.03125, %v4298_v26 }
0x1c98   :  { %v4305_v24 = vsub.f32 %v4293_v20, %v4303_v25 }
0x1c99   :  { %v4304_v29 = vsub.f32 %v4292_v21, %v4302_v23 }
0x1c9a   :  { %v4307_v30 = vmul.f32 %v4305_v24, %v4305_v24 }
0x1c9b   :  { %v4306_v12 = vmul.f32 %v4304_v29, %v4304_v29 }
0x1c9c   :  { %v4311_v31 = vsel %vm81_vm0, %v4307_v30, 0.0 }
0x1c9d   :  { %4312 = vadd.xlane.f32.xlu1 %v4311_v31  ;;  %v4308_v51 = vsel %vm81_vm0, %v4306_v12, 0.0 }
0x1c9e   :  { %4309 = vadd.xlane.f32.xlu0 %v4308_v51 }
0x1d2a   :  { %v4313_v52 = vpop.xlane.xlu1 %4312 }
0x1d2b   :  { %v4315_v53 = vmul.f32 0.03125, %v4313_v52  ;;  %v4310_v56 = vpop.xlane.xlu0 %4309 }
0x1d2c   :  { %v4314_v2 = vmul.f32 0.03125, %v4310_v56 }
0x1d2d   :  { %v4317_v57 = vadd.f32 1e-05, %v4315_v53 }
0x1d2e   :  { %v4316_v8 = vadd.f32 1e-05, %v4314_v2 }
0x1d2f   :  { %5402 = vrsqrt.f32 %v4317_v57 }
0x1d30   :  { %5404 = vrsqrt.f32 %v4316_v8 }
0x1d39   :  { %v5403_v55 = vpop.eup %5402 }
0x1d3a   :  { %v5405_v58 = vpop.eup %5404  ;;  %v4321_v28 = vmul.f32 %v5403_v55, %v4305_v24 }
0x1d3b   :  { %v4320_v59 = vmul.f32 %v5405_v58, %v4304_v29 }
0x1d3c   :  { %v4329_v19 = vmul.f32 %v4678_v27, %v4321_v28 }
0x1d3d   :  { %v4328_v61 = vmul.f32 %v4678_v27, %v4320_v59 }
0x1d3e   :  { %v4337_v54 = vadd.f32 %v4679_v60, %v4329_v19 }
0x1d3f   :  { %v4336_v33 = vadd.f32 %v4679_v60, %v4328_v61 }
0x1d41   :  { %5136 = vmatprep.mubr.msk.f32.mxu1 %vm81_vm0, %v4336_v33 }
0x1d42   :  { %5137 = vmatmul.mubr.msk.f32.vlgmr.msra.gmra.mrb[46].mxu1 %vm81_vm0, %v4337_v54 }
0x1e15   :  { %v5138_v9 = vpop.f32.mrb[46].mxu1 }
0x1e16   :  { %v4427_v43 = vadd.f32 %v5138_v9, %v4680_v7  ;;  %v4421_v3 = vpop.f32.mrb[47].mxu1 }
0x1e17   :  { %v4422_v39 = vadd.f32 %v4680_v7, %v4421_v3 }
0x1e18   :  { %v4431_v11 = vmax.f32 %v4427_v43, 0.0 }
0x1e19   :  { %v4430_v47 = vmax.f32 %v4422_v39, 0.0 }
0x1e1b   :  { %5155 = vmatprep.mubr.msk.f32.mxu0 %vm4447_vm4, %v4430_v47 }
0x1e1c   :  { %5156 = vmatmul.mubr.msk.f32.vlgmr.msra.gmra.mrb[36].mxu0 %vm4447_vm4, %v4431_v11 }
0x1eef   :  { %v5157_v13 = vpop.f32.mrb[36].mxu0 }
0x1ef0   :  { %v4526_v14 = vadd.f32 %v5157_v13, %v4683_v50  ;;  %v4520_v5 = vpop.f32.mrb[37].mxu0 }
0x1ef1   :  { %v4521_v40 = vadd.f32 %v4683_v50, %v4520_v5 }
0x1ef2   :  { %v4530_v15 = vadd.f32 %v4526_v14, %v4337_v54 }
0x1ef3   :  { %v4529_v16 = vadd.f32 %v4521_v40, %v4336_v33 }
0x1ef4   :  { %v4536_v17 = vsel %vm81_vm0, %v4530_v15, 0.0 }
0x1ef5   :  { %4537 = vadd.xlane.f32.xlu1 %v4536_v17  ;;  %v4533_v18 = vsel %vm81_vm0, %v4529_v16, 0.0 }
0x1ef6   :  { %4534 = vadd.xlane.f32.xlu0 %v4533_v18 }
0x1f82   :  { %v4538_v20 = vpop.xlane.xlu1 %4537 }
0x1f83   :  { %v4540_v21 = vmul.f32 0.03125, %v4538_v20  ;;  %v4535_v22 = vpop.xlane.xlu0 %4534 }
0x1f84   :  { %v4539_v1 = vmul.f32 0.03125, %v4535_v22 }
0x1f85   :  { %v4542_v6 = vsub.f32 %v4530_v15, %v4540_v21 }
0x1f86   :  { %v4541_v25 = vsub.f32 %v4529_v16, %v4539_v1 }
0x1f87   :  { %v4544_v26 = vmul.f32 %v4542_v6, %v4542_v6 }
0x1f88   :  { %v4543_v23 = vmul.f32 %v4541_v25, %v4541_v25 }
0x1f89   :  { %v4548_v24 = vsel %vm81_vm0, %v4544_v26, 0.0 }
0x1f8a   :  { %4549 = vadd.xlane.f32.xlu1 %v4548_v24  ;;  %v4545_v29 = vsel %vm81_vm0, %v4543_v23, 0.0 }
0x1f8b   :  { %4546 = vadd.xlane.f32.xlu0 %v4545_v29 }
0x2017   :  { %v4550_v30 = vpop.xlane.xlu1 %4549 }
0x2018   :  { %v4552_v12 = vmul.f32 0.03125, %v4550_v30  ;;  %v4547_v31 = vpop.xlane.xlu0 %4546 }
0x2019   :  { %v4551_v51 = vmul.f32 0.03125, %v4547_v31 }
0x201a   :  { %v4554_v32 = vadd.f32 1e-05, %v4552_v12 }
0x201b   :  { %v4553_v34 = vadd.f32 1e-05, %v4551_v51 }
0x201c   :  { %5406 = vrsqrt.f32 %v4554_v32 }
0x201d   :  { %5408 = vrsqrt.f32 %v4553_v34 }
0x2026   :  { %v5407_v49 = vpop.eup %5406 }
0x2027   :  { %v5409_v35 = vpop.eup %5408  ;;  %v4558_v36 = vmul.f32 %v5407_v49, %v4542_v6 }
0x2028   :  { %v4557_v37 = vmul.f32 %v5409_v35, %v4541_v25 }
0x2029   :  { %v4566_v10 = vmul.f32 %v4686_v0, %v4558_v36 }
0x202a   :  { %v4565_v41 = vmul.f32 %v4686_v0, %v4557_v37 }
0x202b   :  { %v4574_v42 = vadd.f32 %v4687_v38, %v4566_v10 }
0x202c   :  { %v4573_v44 = vadd.f32 %v4687_v38, %v4565_v41 }
0x202d   :  { %4576 = vst.msk [vmem:[#allocation2 + $0x8] sm:$0xff] %vm81_vm0, %v4574_v42 }
0x202e   :  { %4575 = vst.msk [vmem:[#allocation2] sm:$0xff] %vm81_vm0, %v4573_v44 }
0x202f   :  { %5421 = shalt.err (!%p5418_p4)
}
0x2030   :  { %s5422_s21 = scalar_lea.hbm %s6198_s20, 256 }
0x2031   :  { %p5423_p5 = scmp.ne.s32.totalorder %s6198_s20, %s5422_s21  ;;  %p5426_p6 = scmp.lt.u32.totalorder %s5422_s21, %s6198_s20 }
0x2033   :  { %p5428_p7 = pnand %p5426_p6, %p5423_p5 }
0x2035   :  { %5431 = shalt.err (!%p5428_p7)
}
0x2036   :  { %s5448_s28 = smov 128   ;;  %s5449_s10 = smov 8  }
0x2037   :  { %4588 = dma.vmem_to_hbm [thread:$0]  %s4583_s0, 256, %s6198_s20, [#allocation3], %s5448_s28, %s5448_s28, %s5449_s10  }
0x2038   :  { %5432 = dma.done.wait [#allocation3], 256  }
0x2039   :  { %5433 = vsyncadd [#allocation3], 4294967040 }
0x203a   :  { %4592 = vsyncpa [#allocation3], 1 }

</bundles_post_ra>
